<compile_context>
chip_gen: v5e
topology: v5e:2x2
jax: 0.10.0
libtpu: 0.0.40
codegen_flags: <defaults>
</compile_context>

<pallas_src>
import functools

import jax
import jax.numpy as jnp
from jax.experimental import pallas as pl
from jax.experimental.pallas import tpu as pltpu


def _vq_kernel(x_ref, embed_t_ref, half_e_sq_ref, q_ref, ind_ref, loss_ref,
               *, mxu_dtype, n_valid):
    """One row tile: distances, first-occurrence argmin, one-hot gather, loss."""
    x_raw = x_ref[...]                                # (tm, dim), input dtype
    x_f32 = x_raw.astype(jnp.float32)
    x_mxu = x_raw.astype(mxu_dtype)
    e_t = embed_t_ref[...]                            # (n_embed, dim), mxu dtype
    n_embed = e_t.shape[0]
    tm = x_raw.shape[0]

    # xe_T[j, r] = e_j . x_r  — both operands contracted on their last dim
    # (A @ B^T form, MXU-native; no per-tile relayout of the x tile).
    xe_t = jax.lax.dot_general(
        e_t, x_mxu, dimension_numbers=(((1,), (1,)), ((), ())),
        preferred_element_type=jnp.float32)           # (n_embed, tm) f32

    # argmin_j ||x_r - e_j||^2 == argmin_j (0.5*||e_j||^2 - x_r.e_j)
    dist_t = half_e_sq_ref[...] - xe_t                # (n_embed, tm) f32

    # First-occurrence argmin over the codebook axis (sublanes -> mostly VPU;
    # produces the index row lane-dense with no relayout).
    min_row = jnp.min(dist_t, axis=0, keepdims=True)              # (1, tm)
    sub_iota = jax.lax.broadcasted_iota(jnp.int32, dist_t.shape, 0)
    ind_row = jnp.min(jnp.where(dist_t == min_row, sub_iota, n_embed),
                      axis=0, keepdims=True)                       # (1, tm) i32
    ind_row = jnp.minimum(ind_row, n_embed - 1)       # NaN-distance guard
    ind_ref[...] = ind_row.reshape(1, 1, tm)

    # One-hot gather of codebook rows via the MXU (exact: one-hot is 0/1).
    # TODO(synk): this is an A^T @ B contraction; confirm via pl.lower_as_mlir
    # that Mosaic does not materialize a per-tile transpose of onehot_t.
    onehot_t = (sub_iota == ind_row).astype(mxu_dtype)             # (n_embed, tm)
    q = jax.lax.dot_general(
        onehot_t, e_t, dimension_numbers=(((0,), (0,)), ((), ())),
        preferred_element_type=jnp.float32)                        # (tm, dim) f32

    # Commitment-loss partial (per-tile, per-feature); padded rows masked out.
    diff = q - x_f32
    if n_valid is not None:
        row = (pl.program_id(0) * tm
               + jax.lax.broadcasted_iota(jnp.int32, (tm, 1), 0))
        diff = jnp.where(row < n_valid, diff, 0.0)
    loss_ref[...] = jnp.sum(diff * diff, axis=0, keepdims=True)[None]

    # Straight-through output equals q in the eval forward.
    q_ref[...] = q.astype(q_ref.dtype)


def _vmem_limit_bytes():
    """Generation-aware scoped VMEM limit: ~96 MiB on v5e/v6e, ~48 MiB on v7x."""
    cap = 64 << 20                       # conservative fallback (v7x physical)
    try:
        cap = int(pltpu.get_tpu_info().vmem_capacity_bytes)
    except Exception:
        pass
    return min(cap * 3 // 4, 96 << 20)


def _choose_tile(n, dim, n_embed, vmem_limit, tm_max):
    """Row tile: large enough to amortize per-step overhead, small enough to
    (a) keep >= 4 grid steps when n allows (pipelining + megacore) and
    (b) fit the live (n_embed, tm) f32 temporaries + codebook copies +
        double-buffered x/q tiles inside the scoped VMEM limit."""
    dim_p = -(-dim // 128) * 128                       # lane padding of dim
    cap_grid = max(128, (n // (4 * 128)) * 128)
    budget = int(0.6 * vmem_limit) - 2 * n_embed * dim_p * 4
    per_row = 5 * n_embed * 4 + 4 * dim_p * 4          # temporaries + x/q bufs
    cap_vmem = max(128, (budget // per_row) // 128 * 128) if budget > 0 else 128
    return max(128, min(tm_max, cap_grid, cap_vmem))


def vq_precompute(embed, *, mxu_dtype=jnp.float32):
    """Hoistable per-codebook work (transpose + 0.5*||e||^2). Callers invoking
    vector_quantize repeatedly should compute this once and pass it in."""
    dim, n_embed = embed.shape
    e32 = embed.astype(jnp.float32)
    embed_t = jnp.transpose(embed.astype(mxu_dtype))               # (n_embed, dim)
    half_e_sq = 0.5 * jnp.sum(e32 * e32, axis=0).reshape(n_embed, 1)
    return embed_t, half_e_sq, mxu_dtype


def _const_spec(shape, single_buffer):
    index_map = lambda i: (0,) * len(shape)
    if single_buffer:
        # Constant index_map: no need to double-buffer the resident codebook.
        return pl.BlockSpec(shape, index_map, pipeline_mode=pl.Buffered(1))
    return pl.BlockSpec(shape, index_map)


def vector_quantize(x, embed, *, commitment=1.0, tm_max=2048, precomputed=None):
    """Eval-mode VectorQuantize forward.

    x:     (..., dim)  channel-last input
    embed: (dim, n_embed) codebook
    returns (quantize, embed_ind, loss) matching the PyTorch forward
    (embed_ind as int32).
    """
    dim, n_embed = embed.shape
    assert x.shape[-1] == dim
    orig_shape = x.shape
    flatten = x.reshape(-1, dim)
    n = flatten.shape[0]

    if precomputed is None:
        mxu_dtype = (jnp.bfloat16
                     if (x.dtype == jnp.bfloat16 and embed.dtype == jnp.bfloat16)
                     else jnp.float32)
        precomputed = vq_precompute(embed, mxu_dtype=mxu_dtype)
    embed_t, half_e_sq, mxu_dtype = precomputed

    vmem_limit = _vmem_limit_bytes()
    tm = _choose_tile(n, dim, n_embed, vmem_limit, tm_max)
    n_pad = ((n + tm - 1) // tm) * tm
    if n_pad != n:
        flatten = jnp.pad(flatten, ((0, n_pad - n), (0, 0)))
    grid_n = n_pad // tm
    n_valid = None if n_pad == n else n

    kernel = functools.partial(_vq_kernel, mxu_dtype=mxu_dtype, n_valid=n_valid)

    def run(single_buffer_codebook):
        grid_spec = pltpu.PrefetchScalarGridSpec(
            num_scalar_prefetch=0,
            grid=(grid_n,),
            in_specs=[
                pl.BlockSpec((tm, dim), lambda i: (i, 0)),
                _const_spec((n_embed, dim), single_buffer_codebook),
                _const_spec((n_embed, 1), single_buffer_codebook),
            ],
            out_specs=[
                pl.BlockSpec((tm, dim), lambda i: (i, 0)),
                pl.BlockSpec((1, 1, tm), lambda i: (i, 0, 0)),
                pl.BlockSpec((1, 1, dim), lambda i: (i, 0, 0)),
            ],
        )
        return pl.pallas_call(
            kernel,
            out_shape=(
                jax.ShapeDtypeStruct((n_pad, dim), x.dtype),
                jax.ShapeDtypeStruct((grid_n, 1, tm), jnp.int32),
                jax.ShapeDtypeStruct((grid_n, 1, dim), jnp.float32),
            ),
            grid_spec=grid_spec,
            compiler_params=pltpu.CompilerParams(
                dimension_semantics=("parallel",),
                vmem_limit_bytes=vmem_limit),
        )(flatten, embed_t, half_e_sq)

    try:
        q, ind, loss_parts = run(single_buffer_codebook=True)
    except Exception:
        # Pallas versions that reject pipeline_mode / Buffered(1) fall back to
        # the default (double-buffered) codebook specs — identical results.
        q, ind, loss_parts = run(single_buffer_codebook=False)

    quantize = q[:n].reshape(orig_shape)
    embed_ind = ind.reshape(n_pad)[:n].reshape(orig_shape[:-1])
    loss = jnp.sum(loss_parts) * (commitment / float(n * dim))
    return quantize, embed_ind, loss


def _reference(x, embed, commitment=1.0):
    dim = embed.shape[0]
    flatten = x.reshape(-1, dim).astype(jnp.float32)
    e = embed.astype(jnp.float32)
    dist = (jnp.sum(flatten ** 2, axis=1, keepdims=True)
            - 2.0 * jax.lax.dot(flatten, e, precision=jax.lax.Precision.HIGHEST)
            + jnp.sum(e ** 2, axis=0, keepdims=True))
    ind = jnp.argmin(dist, axis=1)
    quantize = e.T[ind]
    loss = jnp.mean((quantize - flatten) ** 2) * commitment
    quantize = flatten + (quantize - flatten)
    return (quantize.reshape(x.shape).astype(x.dtype),
            ind.reshape(x.shape[:-1]).astype(jnp.int32),
            loss)


if __name__ == "__main__":
    dim = 32
    codebook_size = 128
    commitment = 1.0

    key = jax.random.PRNGKey(0)
    kx, ke = jax.random.split(key)
    # channel-last input (B, H, W, dim); B*H*W = 512 rows -> grid of 4 tiles.
    x = jax.random.normal(kx, (2, 16, 16, dim), dtype=jnp.float32)
    embed = jax.random.normal(ke, (dim, codebook_size), dtype=jnp.float32)

    # Hoist the per-codebook precompute out of the per-call path (review item).
    pre = vq_precompute(embed, mxu_dtype=jnp.float32)

    quantize, embed_ind, loss = vector_quantize(
        x, embed, commitment=commitment, precomputed=pre)
    jax.block_until_ready((quantize, embed_ind, loss))

    q_ref, ind_ref, loss_ref = _reference(x, embed, commitment)
    assert quantize.shape == x.shape and embed_ind.shape == x.shape[:-1]
    assert embed_ind.dtype == jnp.int32
    assert bool(jnp.all(embed_ind == ind_ref))
    assert bool(jnp.allclose(quantize, q_ref, atol=1e-4, rtol=1e-4))
    assert bool(jnp.allclose(loss, loss_ref, atol=1e-5, rtol=1e-5))

    print("KERNEL_OK")
</pallas_src>

<mosaic_0001>
module attributes {stable_mosaic.version = 11 : i64} {
  func.func @_vq_kernel(%arg0: i32, %arg1: memref<128x32xf32, #tpu.memory_space<vmem>>, %arg2: memref<128x32xf32, #tpu.memory_space<vmem>>, %arg3: memref<128x1xf32, #tpu.memory_space<vmem>>, %arg4: memref<128x32xf32, #tpu.memory_space<vmem>>, %arg5: memref<1x1x128xi32, #tpu.memory_space<vmem>>, %arg6: memref<1x1x32xf32, #tpu.memory_space<vmem>>) attributes {dimension_semantics = [#tpu.dimension_semantics<parallel>], iteration_bounds = array<i64: 4>, scalar_prefetch = 0 : i64, scratch_operands = 0 : i64, tpu.core_type = #tpu.core_type<tc>, window_params = [{transform_indices = @transform_0, window_bounds = array<i64: 128, 32>}, {pipeline_mode = #tpu.pipeline_mode<synchronous>, transform_indices = @transform_1, window_bounds = array<i64: 128, 32>}, {pipeline_mode = #tpu.pipeline_mode<synchronous>, transform_indices = @transform_2, window_bounds = array<i64: 128, 1>}, {transform_indices = @transform_3, window_bounds = array<i64: 128, 32>}, {transform_indices = @transform_4, window_bounds = array<i64: 1, 1, 128>}, {transform_indices = @transform_5, window_bounds = array<i64: 1, 1, 32>}]} {
    %c0 = arith.constant 0 : index
    %c0_0 = arith.constant 0 : index
    %0 = vector.load %arg1[%c0, %c0_0] : memref<128x32xf32, #tpu.memory_space<vmem>>, vector<128x32xf32>
    %c0_1 = arith.constant 0 : index
    %c0_2 = arith.constant 0 : index
    %1 = vector.load %arg2[%c0_1, %c0_2] : memref<128x32xf32, #tpu.memory_space<vmem>>, vector<128x32xf32>
    %cst = arith.constant dense<0.000000e+00> : vector<128x128xf32>
    %2 = tpu.matmul %1, %0, %cst {dimension_numbers = #tpu.dot_dimension_numbers<[1], [1], [0], [0], [0, 0, 1, 0], [], []>} : vector<128x32xf32>, vector<128x32xf32>, vector<128x128xf32> -> vector<128x128xf32>
    %c0_3 = arith.constant 0 : index
    %c0_4 = arith.constant 0 : index
    %3 = vector.load %arg3[%c0_3, %c0_4] : memref<128x1xf32, #tpu.memory_space<vmem>>, vector<128x1xf32>
    %4 = vector.broadcast %3 : vector<128x1xf32> to vector<128x128xf32>
    %5 = arith.subf %4, %2 : vector<128x128xf32>
    %cst_5 = arith.constant dense<0x7F800000> : vector<128xf32>
    %6 = vector.multi_reduction <minimumf>, %5, %cst_5 [0] : vector<128x128xf32> to vector<128xf32>
    %7 = vector.shape_cast %6 : vector<128xf32> to vector<1x128xf32>
    %8 = tpu.iota {dimensions = array<i32: 0>} : vector<128x128xi32>
    %9 = vector.broadcast %7 : vector<1x128xf32> to vector<128x128xf32>
    %10 = arith.cmpf oeq, %5, %9 : vector<128x128xf32>
    %c128_i32 = arith.constant 128 : i32
    %11 = vector.broadcast %c128_i32 : i32 to vector<128x128xi32>
    %12 = arith.select %10, %8, %11 : vector<128x128xi1>, vector<128x128xi32>
    %cst_6 = arith.constant dense<2147483647> : vector<128xi32>
    %13 = vector.multi_reduction <minsi>, %12, %cst_6 [0] : vector<128x128xi32> to vector<128xi32>
    %14 = vector.shape_cast %13 : vector<128xi32> to vector<1x128xi32>
    %c127_i32 = arith.constant 127 : i32
    %15 = vector.broadcast %c127_i32 : i32 to vector<1x128xi32>
    %16 = arith.minsi %14, %15 : vector<1x128xi32>
    %17 = vector.shape_cast %16 : vector<1x128xi32> to vector<1x1x128xi32>
    %c0_7 = arith.constant 0 : index
    %c0_8 = arith.constant 0 : index
    %c0_9 = arith.constant 0 : index
    %18 = vector.load %arg5[%c0_7, %c0_8, %c0_9] : memref<1x1x128xi32, #tpu.memory_space<vmem>>, vector<1x1x128xi32>
    tpu.vector_store %arg5[%c0_7, %c0_8, %c0_9], %17 {strides = array<i32>} : memref<1x1x128xi32, #tpu.memory_space<vmem>>, vector<1x1x128xi32>,
    %19 = vector.broadcast %16 : vector<1x128xi32> to vector<128x128xi32>
    %20 = arith.cmpi eq, %8, %19 : vector<128x128xi32>
    %21 = arith.extui %20 : vector<128x128xi1> to vector<128x128xi32>
    %22 = arith.sitofp %21 : vector<128x128xi32> to vector<128x128xf32>
    %cst_10 = arith.constant dense<0.000000e+00> : vector<128x32xf32>
    %23 = tpu.matmul %22, %1, %cst_10 {dimension_numbers = #tpu.dot_dimension_numbers<[0], [0], [1], [1], [0, 1, 1, 1], [], []>} : vector<128x128xf32>, vector<128x32xf32>, vector<128x32xf32> -> vector<128x32xf32>
    %24 = arith.subf %23, %0 : vector<128x32xf32>
    %25 = arith.mulf %24, %24 : vector<128x32xf32>
    %cst_11 = arith.constant dense<0.000000e+00> : vector<32xf32>
    %26 = vector.multi_reduction <add>, %25, %cst_11 [0] : vector<128x32xf32> to vector<32xf32>
    %27 = vector.shape_cast %26 : vector<32xf32> to vector<1x32xf32>
    %28 = vector.shape_cast %27 : vector<1x32xf32> to vector<1x1x32xf32>
    %c0_12 = arith.constant 0 : index
    %c0_13 = arith.constant 0 : index
    %c0_14 = arith.constant 0 : index
    %29 = vector.load %arg6[%c0_12, %c0_13, %c0_14] : memref<1x1x32xf32, #tpu.memory_space<vmem>>, vector<1x1x32xf32>
    tpu.vector_store %arg6[%c0_12, %c0_13, %c0_14], %28 {strides = array<i32>} : memref<1x1x32xf32, #tpu.memory_space<vmem>>, vector<1x1x32xf32>,
    %c0_15 = arith.constant 0 : index
    %c0_16 = arith.constant 0 : index
    %30 = vector.load %arg4[%c0_15, %c0_16] : memref<128x32xf32, #tpu.memory_space<vmem>>, vector<128x32xf32>
    tpu.vector_store %arg4[%c0_15, %c0_16], %23 {strides = array<i32>} : memref<128x32xf32, #tpu.memory_space<vmem>>, vector<128x32xf32>,
    return
  }
  func.func @transform_0(%arg0: i32) -> (i32, i32) {
    %c0_i32 = arith.constant 0 : i32
    %c0_i32_0 = arith.constant 0 : i32
    return %arg0, %c0_i32 : i32, i32
  }
  func.func @transform_1(%arg0: i32) -> (i32, i32) {
    %c0_i32 = arith.constant 0 : i32
    %c0_i32_0 = arith.constant 0 : i32
    %c0_i32_1 = arith.constant 0 : i32
    return %c0_i32, %c0_i32_0 : i32, i32
  }
  func.func @transform_2(%arg0: i32) -> (i32, i32) {
    %c0_i32 = arith.constant 0 : i32
    %c0_i32_0 = arith.constant 0 : i32
    %c0_i32_1 = arith.constant 0 : i32
    return %c0_i32, %c0_i32_0 : i32, i32
  }
  func.func @transform_3(%arg0: i32) -> (i32, i32) {
    %c0_i32 = arith.constant 0 : i32
    %c0_i32_0 = arith.constant 0 : i32
    return %arg0, %c0_i32 : i32, i32
  }
  func.func @transform_4(%arg0: i32) -> (i32, i32, i32) {
    %c0_i32 = arith.constant 0 : i32
    %c0_i32_0 = arith.constant 0 : i32
    %c0_i32_1 = arith.constant 0 : i32
    return %arg0, %c0_i32, %c0_i32_0 : i32, i32, i32
  }
  func.func @transform_5(%arg0: i32) -> (i32, i32, i32) {
    %c0_i32 = arith.constant 0 : i32
    %c0_i32_0 = arith.constant 0 : i32
    %c0_i32_1 = arith.constant 0 : i32
    return %arg0, %c0_i32, %c0_i32_0 : i32, i32, i32
  }
}

module attributes {stable_mosaic.version = 11 : i64} {
  func.func @_vq_kernel(%arg0: i32, %arg1: memref<128x32xf32, #tpu.memory_space<vmem>>, %arg2: memref<128x32xf32, #tpu.memory_space<vmem>>, %arg3: memref<128x1xf32, #tpu.memory_space<vmem>>, %arg4: memref<128x32xf32, #tpu.memory_space<vmem>>, %arg5: memref<1x1x128xi32, #tpu.memory_space<vmem>>, %arg6: memref<1x1x32xf32, #tpu.memory_space<vmem>>) attributes {dimension_semantics = [#tpu.dimension_semantics<parallel>], iteration_bounds = array<i64: 4>, scalar_prefetch = 0 : i64, scratch_operands = 0 : i64, tpu.core_type = #tpu.core_type<tc>, window_params = [{transform_indices = @transform_0, window_bounds = array<i64: 128, 32>}, {pipeline_mode = #tpu.pipeline_mode<synchronous>, transform_indices = @transform_1, window_bounds = array<i64: 128, 32>}, {pipeline_mode = #tpu.pipeline_mode<synchronous>, transform_indices = @transform_2, window_bounds = array<i64: 128, 1>}, {transform_indices = @transform_3, window_bounds = array<i64: 128, 32>}, {transform_indices = @transform_4, window_bounds = array<i64: 1, 1, 128>}, {transform_indices = @transform_5, window_bounds = array<i64: 1, 1, 32>}]} {
    %c0 = arith.constant 0 : index
    %c0_0 = arith.constant 0 : index
    %0 = vector.load %arg1[%c0, %c0_0] : memref<128x32xf32, #tpu.memory_space<vmem>>, vector<128x32xf32>
    %c0_1 = arith.constant 0 : index
    %c0_2 = arith.constant 0 : index
    %1 = vector.load %arg2[%c0_1, %c0_2] : memref<128x32xf32, #tpu.memory_space<vmem>>, vector<128x32xf32>
    %cst = arith.constant dense<0.000000e+00> : vector<128x128xf32>
    %2 = tpu.matmul %1, %0, %cst {dimension_numbers = #tpu.dot_dimension_numbers<[1], [1], [0], [0], [0, 0, 1, 0], [], []>} : vector<128x32xf32>, vector<128x32xf32>, vector<128x128xf32> -> vector<128x128xf32>
    %c0_3 = arith.constant 0 : index
    %c0_4 = arith.constant 0 : index
    %3 = vector.load %arg3[%c0_3, %c0_4] : memref<128x1xf32, #tpu.memory_space<vmem>>, vector<128x1xf32>
    %4 = vector.broadcast %3 : vector<128x1xf32> to vector<128x128xf32>
    %5 = arith.subf %4, %2 : vector<128x128xf32>
    %cst_5 = arith.constant dense<0x7F800000> : vector<128xf32>
    %6 = vector.multi_reduction <minimumf>, %5, %cst_5 [0] : vector<128x128xf32> to vector<128xf32>
    %7 = vector.shape_cast %6 : vector<128xf32> to vector<1x128xf32>
    %8 = tpu.iota {dimensions = array<i32: 0>} : vector<128x128xi32>
    %9 = vector.broadcast %7 : vector<1x128xf32> to vector<128x128xf32>
    %10 = arith.cmpf oeq, %5, %9 : vector<128x128xf32>
    %c128_i32 = arith.constant 128 : i32
    %11 = vector.broadcast %c128_i32 : i32 to vector<128x128xi32>
    %12 = arith.select %10, %8, %11 : vector<128x128xi1>, vector<128x128xi32>
    %cst_6 = arith.constant dense<2147483647> : vector<128xi32>
    %13 = vector.multi_reduction <minsi>, %12, %cst_6 [0] : vector<128x128xi32> to vector<128xi32>
    %14 = vector.shape_cast %13 : vector<128xi32> to vector<1x128xi32>
    %c127_i32 = arith.constant 127 : i32
    %15 = vector.broadcast %c127_i32 : i32 to vector<1x128xi32>
    %16 = arith.minsi %14, %15 : vector<1x128xi32>
    %17 = vector.shape_cast %16 : vector<1x128xi32> to vector<1x1x128xi32>
    %c0_7 = arith.constant 0 : index
    %c0_8 = arith.constant 0 : index
    %c0_9 = arith.constant 0 : index
    %18 = vector.load %arg5[%c0_7, %c0_8, %c0_9] : memref<1x1x128xi32, #tpu.memory_space<vmem>>, vector<1x1x128xi32>
    tpu.vector_store %arg5[%c0_7, %c0_8, %c0_9], %17 {strides = array<i32>} : memref<1x1x128xi32, #tpu.memory_space<vmem>>, vector<1x1x128xi32>,
    %19 = vector.broadcast %16 : vector<1x128xi32> to vector<128x128xi32>
    %20 = arith.cmpi eq, %8, %19 : vector<128x128xi32>
    %21 = arith.extui %20 : vector<128x128xi1> to vector<128x128xi32>
    %22 = arith.sitofp %21 : vector<128x128xi32> to vector<128x128xf32>
    %cst_10 = arith.constant dense<0.000000e+00> : vector<128x32xf32>
    %23 = tpu.matmul %22, %1, %cst_10 {dimension_numbers = #tpu.dot_dimension_numbers<[0], [0], [1], [1], [0, 1, 1, 1], [], []>} : vector<128x128xf32>, vector<128x32xf32>, vector<128x32xf32> -> vector<128x32xf32>
    %24 = arith.subf %23, %0 : vector<128x32xf32>
    %25 = arith.mulf %24, %24 : vector<128x32xf32>
    %cst_11 = arith.constant dense<0.000000e+00> : vector<32xf32>
    %26 = vector.multi_reduction <add>, %25, %cst_11 [0] : vector<128x32xf32> to vector<32xf32>
    %27 = vector.shape_cast %26 : vector<32xf32> to vector<1x32xf32>
    %28 = vector.shape_cast %27 : vector<1x32xf32> to vector<1x1x32xf32>
    %c0_12 = arith.constant 0 : index
    %c0_13 = arith.constant 0 : index
    %c0_14 = arith.constant 0 : index
    %29 = vector.load %arg6[%c0_12, %c0_13, %c0_14] : memref<1x1x32xf32, #tpu.memory_space<vmem>>, vector<1x1x32xf32>
    tpu.vector_store %arg6[%c0_12, %c0_13, %c0_14], %28 {strides = array<i32>} : memref<1x1x32xf32, #tpu.memory_space<vmem>>, vector<1x1x32xf32>,
    %c0_15 = arith.constant 0 : index
    %c0_16 = arith.constant 0 : index
    %30 = vector.load %arg4[%c0_15, %c0_16] : memref<128x32xf32, #tpu.memory_space<vmem>>, vector<128x32xf32>
    tpu.vector_store %arg4[%c0_15, %c0_16], %23 {strides = array<i32>} : memref<128x32xf32, #tpu.memory_space<vmem>>, vector<128x32xf32>,
    return
  }
  func.func @transform_0(%arg0: i32) -> (i32, i32) {
    %c0_i32 = arith.constant 0 : i32
    %c0_i32_0 = arith.constant 0 : i32
    return %arg0, %c0_i32 : i32, i32
  }
  func.func @transform_1(%arg0: i32) -> (i32, i32) {
    %c0_i32 = arith.constant 0 : i32
    %c0_i32_0 = arith.constant 0 : i32
    %c0_i32_1 = arith.constant 0 : i32
    return %c0_i32, %c0_i32_0 : i32, i32
  }
  func.func @transform_2(%arg0: i32) -> (i32, i32) {
    %c0_i32 = arith.constant 0 : i32
    %c0_i32_0 = arith.constant 0 : i32
    %c0_i32_1 = arith.constant 0 : i32
    return %c0_i32, %c0_i32_0 : i32, i32
  }
  func.func @transform_3(%arg0: i32) -> (i32, i32) {
    %c0_i32 = arith.constant 0 : i32
    %c0_i32_0 = arith.constant 0 : i32
    return %arg0, %c0_i32 : i32, i32
  }
  func.func @transform_4(%arg0: i32) -> (i32, i32, i32) {
    %c0_i32 = arith.constant 0 : i32
    %c0_i32_0 = arith.constant 0 : i32
    %c0_i32_1 = arith.constant 0 : i32
    return %arg0, %c0_i32, %c0_i32_0 : i32, i32, i32
  }
  func.func @transform_5(%arg0: i32) -> (i32, i32, i32) {
    %c0_i32 = arith.constant 0 : i32
    %c0_i32_0 = arith.constant 0 : i32
    %c0_i32_1 = arith.constant 0 : i32
    return %arg0, %c0_i32, %c0_i32_0 : i32, i32, i32
  }
}

</mosaic_0001>

<bundles_post_ra>
// kernel: tpu_custom_call.1
= control target key start
LH: loop header
LB: loop body
LE: loop exit
PB: predicated region body
PF: predicated region fallthrough
CT: control target
= control target key end

     0   :  { %11 = vsyncpa [#allocation3], 0  ;;  %s1982_s0 = inlined_call_operand.vmem [shape: f32[512,32], index: 0, kind: input, shape index: {}]   ;;  %s1983_s1 = inlined_call_operand.vmem [shape: f32[128,32], index: 1, kind: input, shape index: {}]   ;;  %s1984_s2 = inlined_call_operand.vmem [shape: f32[128,1], index: 2, kind: input, shape index: {}]   ;;  %s1985_s3 = inlined_call_operand.vmem [shape: f32[512,32], index: 3, kind: output, shape index: {0}]   ;;  %s1986_s4 = inlined_call_operand.hbm [shape: s32[4,1,128], index: 4, kind: output, shape index: {1}]   ;;  %s1987_s5 = inlined_call_operand.hbm [shape: f32[4,1,32], index: 5, kind: output, shape index: {2}]  }
   0x1   :  { %13 = vsyncpa [#allocation3 + $0x1], 0 }
   0x2   :  { %14 = vsyncpa [#allocation5], 0 }
   0x3   :  { %16 = vsyncpa [#allocation5 + $0x1], 0  ;;  %s1344_s18 = smov 0   ;;  %s1346_s19 = smov 0  }
   0x4   :  { %s1348_s20 = smov 0   ;;  %s1350_s21 = smov 0  }
   0x5 LB: > { %s1365_s22 = sadd.s32 4294967295, %s1310_s21   ;;  %s1044_s23 = sadd.s32 4294967294, %s1310_s21   ;;  %s1310_s21 = sphi %s1350_s21, %s2025_s21   ;;  %s1306_s20 = sphi %s1348_s20, %s2024_s20   ;;  %s1302_s19 = sphi %s1346_s19, %s2023_s19   ;;  %s1298_s18 = sphi %s1344_s18, %s2022_s18  }
   0x6   : > { %s1369_s24 = sadd.s32 1, %s1310_s21   ;;  %s123_s25 = sadd.s32 1, %s1306_s20 }
   0x7   : > { %s120_s26 = ssub.s32 %s1310_s21, %s1369_s24  ;;  %p133_p0 = scmp.ne.s32.totalorder %s1306_s20, %s1302_s19 }
   0x8   : > { %p121_p1 = scmp.eq.s32.totalorder %s120_s26, 0  ;;  %p134_p2 = scmp.eq.s32.totalorder %s1365_s22, 3 }
   0x9   : > { %p139_p3 = scmp.ne.s32.totalorder %s1302_s19, %s1298_s18  ;;  %p140_p4 = scmp.eq.s32.totalorder %s1044_s23, 3 }
   0xa   : > { %s1380_s27 = scalar_select %p121_p1, %s1306_s20, %s123_s25  }
   0xb   : > { %p1382_p5 = por %p134_p2, %p133_p0  ;;  %p1386_p6 = por %p140_p4, %p139_p3 }
   0xc   : > { %p1047_p7 = scmp.ge.s32.totalorder %s1310_s21, 1  ;;  %p199_p8 = scmp.lt.s32.totalorder %s1310_s21, 5 }
   0xe   : > { %p200_p9 = pnand %p1047_p7, %p199_p8 }
   0xf   : > { %s1048_s30 = sshll.u32 (!%p200_p9), %s1365_s22, 4  ;;  %s1838_s8 = sand.u32 (!%p200_p9), 1, %s1302_s19  }
  0x10   : > { %203 = sbr.rel (%p200_p9) target bundleno = 763 (0x2fb), region = 32  ;;  %p236_p10 = scmp.lt.s32.totalorder (!%p200_p9), %s1048_s30, 63 }
  0x11   : > { %s228_s10 = scalar_lea.vmem (!%p200_p9), [#allocation2], %s1838_s8  ;;  %s903_s17 = scalar_lea.sflag (!%p200_p9), [#allocation3], %s1838_s8 }
  0x12   : > { %s921_s15 = sshll.u32 (!%p200_p9), %s228_s10, 4  ;;  %s1236_s11 = scalar_lea.hbm (!%p200_p9), %s1986_s4, 4  ;;  %s922_s15 = int_to_ptr.vmem [resolvable:$true] %s921_s15 }
  0x15   : > { %s2027_s30 = smov (!%p236_p10, %s1048_s30), 63  ;;  %vm1988_vm0 = vcmask 261120   ;;  %v441_v6 = vld [vmem:[%s1984_s2] sm:$0xff]  ;;  %v1312_v7 = vmov 0   ;;  %v442_v10 = vld [vmem:[%s1984_s2 + $0x8] sm:$0xff]  ;;  %v443_v12 = vld [vmem:[%s1984_s2 + $0x10] sm:$0xff] }
  0x16   : > { %s1049_s6 = sshll.u32 %s2027_s30, 3  ;;  %1212 = vset.pattern.permute.xlu0 %v1312_v7  ;;  %1213 = vset.pattern.permute.xlu1 %v1312_v7  ;;  %v447_v13 = vld [vmem:[%s1984_s2 + $0x30] sm:$0xff]  ;;  %v444_v16 = vld [vmem:[%s1984_s2 + $0x18] sm:$0xff]  ;;  %v450_v17 = vld [vmem:[%s1984_s2 + $0x48] sm:$0xff] }
  0x17   : > { %s1401_s9 = scalar_lea.vmem %s1982_s0, %s1049_s6  ;;  %459 = vperm.xlu0 %1212, %v441_v6   ;;  %1214 = vset.pattern.permute.xlu2 %v1312_v7  ;;  %v448_v20 = vld [vmem:[%s1984_s2 + $0x38] sm:$0xff]  ;;  %v453_v21 = vld [vmem:[%s1984_s2 + $0x60] sm:$0xff]  ;;  %v451_v25 = vld [vmem:[%s1984_s2 + $0x50] sm:$0xff]  ;;  %s1866_s13 = scalar_lea.vmem %s1985_s3, %s1049_s6 }
  0x18   : > { %v262_v0 = vld [vmem:[%s1401_s9 + $0x78] sm:$0xff]  ;;  %v1408_v1 = vld [vmem:[%s1401_s9 + $0x70] sm:$0xff]  ;;  %v1417_v2 = vld [vmem:[%s1401_s9 + $0x68] sm:$0xff]  ;;  %469 = vperm.xlu1 %1213, %v443_v12   ;;  %s919_s6 = scalar_lea.hbm %s1986_s4, %s1365_s22 }
  0x19   : > { %1052 = vmatpush.xpose.msk.msra.mxu0 %vm1988_vm0, %v262_v0  ;;  %1102 = vmatpush.xpose.msk.msra.mxu2 %vm1988_vm0, %v262_v0  ;;  %v1426_v3 = vld [vmem:[%s1401_s9 + $0x60] sm:$0xff]  ;;  %v1435_v4 = vld [vmem:[%s1401_s9 + $0x58] sm:$0xff]  ;;  %v1444_v5 = vld [vmem:[%s1401_s9 + $0x50] sm:$0xff]  ;;  %s923_s16 = sshll.u32 %s919_s6, 4  ;;  %s924_s16 = int_to_ptr.hbm [resolvable:$true] %s923_s16 }
  0x1a   : > { %1103 = vmatpush.xpose.msk.msra.mxu3 %vm1988_vm0, %v262_v0  ;;  %v1456_v8 = vld [vmem:[%s1401_s9 + $0x48] sm:$0xff]  ;;  %v1465_v9 = vld [vmem:[%s1401_s9 + $0x40] sm:$0xff]  ;;  %v1477_v11 = vld [vmem:[%s1401_s9 + $0x38] sm:$0xff]  ;;  %s1230_s23 = sshra.s32 %s924_s16, 4  ;;  %s1231_s23 = int_to_ptr.hbm [resolvable:$true] %s1230_s23 }
  0x1b   : > { %v1492_v14 = vld [vmem:[%s1401_s9 + $0x30] sm:$0xff]  ;;  %v1501_v15 = vld [vmem:[%s1401_s9 + $0x28] sm:$0xff]  ;;  %v1516_v18 = vld [vmem:[%s1401_s9 + $0x20] sm:$0xff]  ;;  %s1232_s25 = scalar_lea.hbm %s1231_s23, 1  ;;  %p1237_p0 = scmp.lt.s32.totalorder %s1231_s23, %s1986_s4 }
  0x1c   : > { %v1525_v19 = vld [vmem:[%s1401_s9 + $0x18] sm:$0xff]  ;;  %v1540_v22 = vld [vmem:[%s1401_s9 + $0x10] sm:$0xff]  ;;  %v1549_v23 = vld [vmem:[%s1401_s9 + $0x8] sm:$0xff]  ;;  %p1233_p11 = scmp.ne.s32.totalorder %s1231_s23, %s1232_s25  ;;  %p1238_p1 = scmp.lt.s32.totalorder %s1236_s11, %s1232_s25 }
  0x1d   : > { %1053 = vmatpush.xpose.msk.msra.mxu0 %vm1988_vm0, %v1408_v1  ;;  %1104 = vmatpush.xpose.msk.msra.mxu2 %vm1988_vm0, %v1408_v1  ;;  %v445_v24 = vld [vmem:[%s1984_s2 + $0x20] sm:$0xff]  ;;  %v456_v26 = vld [vmem:[%s1984_s2 + $0x78] sm:$0xff]  ;;  %v1587_v30 = vld [vmem:[%s1983_s1 + $0x28] sm:$0xff] }
  0x1e   : > { %1105 = vmatpush.xpose.msk.msra.mxu3 %vm1988_vm0, %v1408_v1  ;;  %v1567_v27 = vld [vmem:[%s1401_s9] sm:$0xff]  ;;  %v1572_v28 = vld [vmem:[%s1983_s1 + $0x78] sm:$0xff]  ;;  %479 = vperm.xlu2 %1214, %v445_v24   ;;  %v277_v32 = vld [vmem:[%s1983_s1 + $0x70] sm:$0xff]  ;;  %p1234_p12 = pnand %p1233_p11, %p1382_p5  ;;  %p1239_p2 = por %p1238_p1, %p1237_p0 }
  0x1f   : > { %464 = vperm.xlu0 %1212, %v442_v10   ;;  %1134 = vmatpush.msra.mxu1 %v1572_v28  ;;  %v1582_v29 = vld [vmem:[%s1983_s1] sm:$0xff]  ;;  %v446_v33 = vld [vmem:[%s1984_s2 + $0x28] sm:$0xff]  ;;  %v269_v37 = vld [vmem:[%s1983_s1 + $0x30] sm:$0xff] }
  0x20   : > { %474 = vperm.xlu1 %1213, %v444_v16   ;;  %v275_v31 = vld [vmem:[%s1983_s1 + $0x60] sm:$0xff]  ;;  %v454_v34 = vld [vmem:[%s1984_s2 + $0x68] sm:$0xff]  ;;  %v274_v39 = vld [vmem:[%s1983_s1 + $0x58] sm:$0xff]  ;;  %p1235_p13 = pneg %p1234_p12 }
  0x21   : > { %1054 = vmatpush.xpose.msk.msra.mxu0 %vm1988_vm0, %v1417_v2  ;;  %1106 = vmatpush.xpose.msk.msra.mxu2 %vm1988_vm0, %v1417_v2  ;;  %v276_v35 = vld [vmem:[%s1983_s1 + $0x68] sm:$0xff]  ;;  %v449_v38 = vld [vmem:[%s1984_s2 + $0x40] sm:$0xff]  ;;  %v273_v40 = vld [vmem:[%s1983_s1 + $0x50] sm:$0xff] }
  0x22   : > { %1107 = vmatpush.xpose.msk.msra.mxu3 %vm1988_vm0, %v1417_v2  ;;  %1136 = vmatpush.msra.mxu1 %v277_v32  ;;  %v1616_v36 = vld [vmem:[%s1983_s1 + $0x8] sm:$0xff]  ;;  %v265_v42 = vld [vmem:[%s1983_s1 + $0x10] sm:$0xff]  ;;  %v270_v43 = vld [vmem:[%s1983_s1 + $0x38] sm:$0xff]  ;;  %p1240_p3 = pnand %p1239_p2, %p1235_p13 }
  0x23   : > { %v272_v41 = vld [vmem:[%s1983_s1 + $0x48] sm:$0xff]  ;;  %v271_v44 = vld [vmem:[%s1983_s1 + $0x40] sm:$0xff]  ;;  %v452_v45 = vld [vmem:[%s1984_s2 + $0x58] sm:$0xff] }
  0x24   : > { %1138 = vmatpush.msra.mxu1 %v276_v35  ;;  %v266_v46 = vld [vmem:[%s1983_s1 + $0x18] sm:$0xff]  ;;  %v267_v47 = vld [vmem:[%s1983_s1 + $0x20] sm:$0xff]  ;;  %v455_v48 = vld [vmem:[%s1984_s2 + $0x70] sm:$0xff] }
  0x25   : > { %1055 = vmatpush.xpose.msk.msra.mxu0 %vm1988_vm0, %v1426_v3  ;;  %1108 = vmatpush.xpose.msk.msra.mxu2 %vm1988_vm0, %v1426_v3 }
  0x26   : > { %1109 = vmatpush.xpose.msk.msra.mxu3 %vm1988_vm0, %v1426_v3  ;;  %484 = vperm.xlu2 %1214, %v446_v33  }
  0x27   : > { %489 = vperm.xlu0 %1212, %v447_v13   ;;  %1140 = vmatpush.msra.mxu1 %v275_v31 }
  0x28   : > { %494 = vperm.xlu1 %1213, %v448_v20  }
  0x29   : > { %1056 = vmatpush.xpose.msk.msra.mxu0 %vm1988_vm0, %v1435_v4  ;;  %1110 = vmatpush.xpose.msk.msra.mxu2 %vm1988_vm0, %v1435_v4 }
  0x2a   : > { %1111 = vmatpush.xpose.msk.msra.mxu3 %vm1988_vm0, %v1435_v4  ;;  %1142 = vmatpush.msra.mxu1 %v274_v39 }
  0x2c   : > { %1144 = vmatpush.msra.mxu1 %v273_v40 }
  0x2d   : > { %1057 = vmatpush.xpose.msk.msra.mxu0 %vm1988_vm0, %v1444_v5  ;;  %1112 = vmatpush.xpose.msk.msra.mxu2 %vm1988_vm0, %v1444_v5 }
  0x2e   : > { %1113 = vmatpush.xpose.msk.msra.mxu3 %vm1988_vm0, %v1444_v5  ;;  %499 = vperm.xlu2 %1214, %v449_v38  }
  0x2f   : > { %504 = vperm.xlu0 %1212, %v450_v17   ;;  %1146 = vmatpush.msra.mxu1 %v272_v41 }
  0x30   : > { %509 = vperm.xlu1 %1213, %v451_v25  }
  0x31   : > { %1058 = vmatpush.xpose.msk.msra.mxu0 %vm1988_vm0, %v1456_v8  ;;  %1114 = vmatpush.xpose.msk.msra.mxu2 %vm1988_vm0, %v1456_v8 }
  0x32   : > { %1115 = vmatpush.xpose.msk.msra.mxu3 %vm1988_vm0, %v1456_v8  ;;  %1148 = vmatpush.msra.mxu1 %v271_v44 }
  0x34   : > { %1150 = vmatpush.msra.mxu1 %v270_v43 }
  0x35   : > { %1059 = vmatpush.xpose.msk.msra.mxu0 %vm1988_vm0, %v1465_v9  ;;  %1116 = vmatpush.xpose.msk.msra.mxu2 %vm1988_vm0, %v1465_v9 }
  0x36   : > { %1117 = vmatpush.xpose.msk.msra.mxu3 %vm1988_vm0, %v1465_v9  ;;  %514 = vperm.xlu2 %1214, %v452_v45  }
  0x37   : > { %519 = vperm.xlu0 %1212, %v453_v21   ;;  %1152 = vmatpush.msra.mxu1 %v269_v37 }
  0x38   : > { %524 = vperm.xlu1 %1213, %v454_v34  }
  0x39   : > { %1060 = vmatpush.xpose.msk.msra.mxu0 %vm1988_vm0, %v1477_v11  ;;  %1118 = vmatpush.xpose.msk.msra.mxu2 %vm1988_vm0, %v1477_v11 }
  0x3a   : > { %1119 = vmatpush.xpose.msk.msra.mxu3 %vm1988_vm0, %v1477_v11  ;;  %1154 = vmatpush.msra.mxu1 %v1587_v30 }
  0x3c   : > { %1156 = vmatpush.msra.mxu1 %v267_v47 }
  0x3d   : > { %1061 = vmatpush.xpose.msk.msra.mxu0 %vm1988_vm0, %v1492_v14  ;;  %1120 = vmatpush.xpose.msk.msra.mxu2 %vm1988_vm0, %v1492_v14 }
  0x3e   : > { %1121 = vmatpush.xpose.msk.msra.mxu3 %vm1988_vm0, %v1492_v14  ;;  %529 = vperm.xlu2 %1214, %v455_v48  }
  0x3f   : > { %534 = vperm.xlu0 %1212, %v456_v26   ;;  %1158 = vmatpush.msra.mxu1 %v266_v46 }
  0x41   : > { %1062 = vmatpush.xpose.msk.msra.mxu0 %vm1988_vm0, %v1501_v15  ;;  %1122 = vmatpush.xpose.msk.msra.mxu2 %vm1988_vm0, %v1501_v15 }
  0x42   : > { %1123 = vmatpush.xpose.msk.msra.mxu3 %vm1988_vm0, %v1501_v15  ;;  %1160 = vmatpush.msra.mxu1 %v265_v42 }
  0x44   : > { %1162 = vmatpush.msra.mxu1 %v1616_v36 }
  0x45   : > { %1063 = vmatpush.xpose.msk.msra.mxu0 %vm1988_vm0, %v1516_v18  ;;  %1124 = vmatpush.xpose.msk.msra.mxu2 %vm1988_vm0, %v1516_v18 }
  0x46   : > { %1125 = vmatpush.xpose.msk.msra.mxu3 %vm1988_vm0, %v1516_v18  ;;  %1164 = vmatpush.msra.mxu1 %v1582_v29 }
  0x49   : > { %1064 = vmatpush.xpose.msk.msra.mxu0 %vm1988_vm0, %v1525_v19  ;;  %1126 = vmatpush.xpose.msk.msra.mxu2 %vm1988_vm0, %v1525_v19 }
  0x4a   : > { %1127 = vmatpush.xpose.msk.msra.mxu3 %vm1988_vm0, %v1525_v19 }
  0x4d   : > { %1065 = vmatpush.xpose.msk.msra.mxu0 %vm1988_vm0, %v1540_v22  ;;  %1128 = vmatpush.xpose.msk.msra.mxu2 %vm1988_vm0, %v1540_v22 }
  0x4e   : > { %1129 = vmatpush.xpose.msk.msra.mxu3 %vm1988_vm0, %v1540_v22 }
  0x51   : > { %1066 = vmatpush.xpose.msk.msra.mxu0 %vm1988_vm0, %v1549_v23  ;;  %1130 = vmatpush.xpose.msk.msra.mxu2 %vm1988_vm0, %v1549_v23 }
  0x52   : > { %1131 = vmatpush.xpose.msk.msra.mxu3 %vm1988_vm0, %v1549_v23 }
  0x55   : > { %1067 = vmatpush.xpose.msk.msra.mxu0 %vm1988_vm0, %v1567_v27  ;;  %1132 = vmatpush.xpose.msk.msra.mxu2 %vm1988_vm0, %v1567_v27 }
  0x56   : > { %1133 = vmatpush.xpose.msk.msra.mxu3 %vm1988_vm0, %v1567_v27 }
  0x58   : > { %1068 = vmatmul.msk.f32.vlgmr.msra.gmra.mxu0 %vm1988_vm0, %v1582_v29  ;;  %1073 = vmatmul.msk.f32.vlgmr.msra.gmra.mxu2 %vm1988_vm0, %v1587_v30 }
  0x59   : > { %745 = vmatpush.msrb.mxu0 %v1572_v28  ;;  %1080 = vmatmul.msk.f32.vlgmr.msra.gmra.mxu3 %vm1988_vm0, %v275_v31 }
  0x5a   : > { %1135 = vmatpush.msrb.mxu3 %v1572_v28 }
  0x5b   : > { %746 = vmatpush.msrb.mxu0 %v277_v32 }
  0x5c   : > { %1137 = vmatpush.msrb.mxu3 %v277_v32 }
  0x5d   : > { %747 = vmatpush.msrb.mxu0 %v276_v35 }
  0x5e   : > { %1139 = vmatpush.msrb.mxu3 %v276_v35 }
  0x5f   : > { %748 = vmatpush.msrb.mxu0 %v275_v31 }
  0x60   : > { %1069 = vmatmul.msk.f32.gmra.mxu0 %vm1988_vm0, %v1616_v36  ;;  %1074 = vmatmul.msk.f32.gmra.mxu2 %vm1988_vm0, %v269_v37 }
  0x61   : > { %1081 = vmatmul.msk.f32.gmra.mxu3 %vm1988_vm0, %v276_v35  ;;  %749 = vmatpush.msrb.mxu0 %v274_v39 }
  0x62   : > { %1141 = vmatpush.msrb.mxu3 %v275_v31 }
  0x63   : > { %750 = vmatpush.msrb.mxu0 %v273_v40 }
  0x64   : > { %1143 = vmatpush.msrb.mxu3 %v274_v39 }
  0x65   : > { %751 = vmatpush.msrb.mxu0 %v272_v41 }
  0x66   : > { %1145 = vmatpush.msrb.mxu3 %v273_v40 }
  0x67   : > { %752 = vmatpush.msrb.mxu0 %v271_v44 }
  0x68   : > { %1070 = vmatmul.msk.f32.gmra.mxu0 %vm1988_vm0, %v265_v42  ;;  %1075 = vmatmul.msk.f32.gmra.mxu2 %vm1988_vm0, %v270_v43 }
  0x69   : > { %1082 = vmatmul.msk.f32.gmra.mxu3 %vm1988_vm0, %v277_v32  ;;  %753 = vmatpush.msrb.mxu0 %v270_v43 }
  0x6a   : > { %1147 = vmatpush.msrb.mxu3 %v272_v41 }
  0x6b   : > { %754 = vmatpush.msrb.mxu0 %v269_v37 }
  0x6c   : > { %1149 = vmatpush.msrb.mxu3 %v271_v44 }
  0x6d   : > { %755 = vmatpush.msrb.mxu0 %v1587_v30 }
  0x6e   : > { %1151 = vmatpush.msrb.mxu3 %v270_v43 }
  0x6f   : > { %756 = vmatpush.msrb.mxu0 %v267_v47 }
  0x70   : > { %1071 = vmatmul.msk.f32.gmra.mxu0 %vm1988_vm0, %v266_v46  ;;  %1076 = vmatmul.msk.f32.gmra.mxu2 %vm1988_vm0, %v271_v44 }
  0x71   : > { %1083 = vmatmul.msk.f32.gmra.mxu3 %vm1988_vm0, %v1572_v28  ;;  %757 = vmatpush.msrb.mxu0 %v266_v46 }
  0x72   : > { %1153 = vmatpush.msrb.mxu3 %v269_v37 }
  0x73   : > { %758 = vmatpush.msrb.mxu0 %v265_v42 }
  0x74   : > { %1155 = vmatpush.msrb.mxu3 %v1587_v30 }
  0x75   : > { %759 = vmatpush.msrb.mxu0 %v1616_v36 }
  0x76   : > { %1157 = vmatpush.msrb.mxu3 %v267_v47 }
  0x77   : > { %760 = vmatpush.msrb.mxu0 %v1582_v29 }
  0x78   : > { %1072 = vmatmul.msk.f32.gmra.mxu0 %vm1988_vm0, %v267_v47  ;;  %1077 = vmatmul.msk.f32.gmra.mxu2 %vm1988_vm0, %v272_v41  ;;  %v480_v53 = vpop.permute.xlu2 %479 }
  0x79   : > { %1159 = vmatpush.msrb.mxu3 %v266_v46 }
  0x7b   : > { %1161 = vmatpush.msrb.mxu3 %v265_v42 }
  0x7d   : > { %1163 = vmatpush.msrb.mxu3 %v1616_v36 }
  0x7f   : > { %1165 = vmatpush.msrb.mxu3 %v1582_v29 }
  0x80   : > { %1078 = vmatmul.msk.f32.gmra.mxu2 %vm1988_vm0, %v273_v40  ;;  %v485_v59 = vpop.permute.xlu2 %484 }
  0x88   : > { %1079 = vmatmul.msk.f32.gmra.mxu2 %vm1988_vm0, %v274_v39  ;;  %v500_v6 = vpop.permute.xlu2 %499 }
  0x89   : > { %v460_v50 = vpop.permute.xlu0 %459 }
  0x8a   : > { %v470_v52 = vpop.permute.xlu1 %469 }
  0x90   : > { %v515_v17 = vpop.permute.xlu2 %514 }
  0x91   : > { %v465_v56 = vpop.permute.xlu0 %464 }
  0x92   : > { %v475_v57 = vpop.permute.xlu1 %474 }
  0x98   : > { %v530_v41 = vpop.permute.xlu2 %529 }
  0x99   : > { %v490_v62 = vpop.permute.xlu0 %489 }
  0x9a   : > { %v495_v0 = vpop.permute.xlu1 %494 }
  0xa1   : > { %v505_v12 = vpop.permute.xlu0 %504 }
  0xa2   : > { %v510_v16 = vpop.permute.xlu1 %509 }
  0xa9   : > { %v520_v24 = vpop.permute.xlu0 %519 }
  0xaa   : > { %v525_v35 = vpop.permute.xlu1 %524 }
  0xd5   : > { %v393_v49 = vpop.f32.mrf.mxu0 }
  0xd6   : > { %v1684_v30 = vsub.f32 %v460_v50, %v393_v49 }
  0xdb   : > { %v408_v51 = vpop.f32.mrf.mxu2 }
  0xdc   : > { %v429_v60 = vpop.f32.mrf.mxu3  ;;  %v1682_v29 = vsub.f32 %v485_v59, %v408_v51 }
  0xdd   : > { %v396_v54 = vpop.f32.mrf.mxu0  ;;  %v1715_v51 = vsub.f32 %v520_v24, %v429_v60  ;;  %v574_v60 = vlaneseq }
  0xde   : > { %v1678_v25 = vsub.f32 %v465_v56, %v396_v54 }
  0xe0   : > { %v554_v33 = vmin.f32 %v1678_v25, %v1682_v29 }
  0xe3   : > { %v411_v55 = vpop.f32.mrf.mxu2 }
  0xe4   : > { %v432_v7 = vpop.f32.mrf.mxu3  ;;  %v1692_v34 = vsub.f32 %v490_v62, %v411_v55 }
  0xe5   : > { %v399_v61 = vpop.f32.mrf.mxu0  ;;  %v1707_v44 = vsub.f32 %v525_v35, %v432_v7  ;;  %v1726_v7 = vshrl.u32 %v574_v60, 7 }
  0xe6   : > { %v1686_v31 = vsub.f32 %v470_v52, %v399_v61  ;;  %v535_v52 = vpop.permute.xlu0 %534 }
  0xe7   : > { %v1741_v24 = vadd.s32 40, %v1726_v7  ;;  %v1750_v35 = vadd.s32 64, %v1726_v7 }
  0xe8   : > { %v555_v39 = vmin.f32 %v1686_v31, %v1692_v34 }
  0xeb   : > { %v414_v58 = vpop.f32.mrf.mxu2 }
  0xec   : > { %v435_v20 = vpop.f32.mrf.mxu3  ;;  %v1702_v40 = vsub.f32 %v495_v0, %v414_v58 }
  0xed   : > { %v402_v10 = vpop.f32.mrf.mxu0 }
  0xee   : > { %v1694_v36 = vsub.f32 %v475_v57, %v402_v10 }
  0xf0   : > { %v556_v47 = vmin.f32 %v1694_v36, %v1702_v40 }
  0xf3   : > { %v417_v63 = vpop.f32.mrf.mxu2 }
  0xf4   : > { %v1704_v42 = vsub.f32 %v500_v6, %v417_v63  ;;  %v438_v45 = vpop.f32.mrf.mxu3 }
  0xf5   : > { %v405_v21 = vpop.f32.mrf.mxu0  ;;  %v1719_v54 = vsub.f32 %v535_v52, %v438_v45  ;;  %v1762_v45 = vadd.s32 96, %v1726_v7 }
  0xf6   : > { %v1680_v28 = vsub.f32 %v480_v53, %v405_v21  ;;  %v1717_v53 = vsub.f32 %v530_v41, %v435_v20  ;;  %v1735_v20 = vadd.s32 24, %v1726_v7  ;;  %v1738_v21 = vadd.s32 32, %v1726_v7 }
  0xf7   : > { %v1756_v41 = vadd.s32 80, %v1726_v7 }
  0xf8   : > { %v553_v37 = vmin.f32 %v1684_v30, %v1680_v28 }
  0xfa   : > { %v557_v48 = vmin.f32 %v553_v37, %v1704_v42 }
  0xfb   : > { %v420_v13 = vpop.f32.mrf.mxu2 }
  0xfc   : > { %v1688_v32 = vsub.f32 %v505_v12, %v420_v13  ;;  %v561_v57 = vmin.f32 %v557_v48, %v1715_v51  ;;  %v1729_v13 = vadd.s32 8, %v1726_v7  ;;  %v1771_v48 = vadd.s32 120, %v1726_v7 }
  0xfe   : > { %v558_v43 = vmin.f32 %v554_v33, %v1688_v32  ;;  %v1747_v33 = vadd.s32 56, %v1726_v7 }
 0x100   : > { %v562_v55 = vmin.f32 %v558_v43, %v1707_v44  ;;  %v1759_v43 = vadd.s32 88, %v1726_v7 }
 0x102   : > { %v565_v61 = vmin.f32 %v561_v57, %v562_v55 }
 0x103   : > { %v423_v26 = vpop.f32.mrf.mxu2 }
 0x104   : > { %v1698_v38 = vsub.f32 %v510_v16, %v423_v26  ;;  %v1744_v26 = vadd.s32 48, %v1726_v7 }
 0x106   : > { %v559_v49 = vmin.f32 %v555_v39, %v1698_v38  ;;  %v1753_v39 = vadd.s32 72, %v1726_v7 }
 0x108   : > { %v563_v58 = vmin.f32 %v559_v49, %v1717_v53 }
 0x10b   : > { %v426_v46 = vpop.f32.mrf.mxu2 }
 0x10c   : > { %v1713_v50 = vsub.f32 %v515_v17, %v426_v46  ;;  %v1732_v17 = vadd.s32 16, %v1726_v7  ;;  %v1765_v46 = vadd.s32 104, %v1726_v7 }
 0x10e   : > { %v560_v56 = vmin.f32 %v556_v47, %v1713_v50  ;;  %v1768_v47 = vadd.s32 112, %v1726_v7 }
 0x110   : > { %v564_v59 = vmin.f32 %v560_v56, %v1719_v54 }
 0x112   : > { %v566_v62 = vmin.f32 %v563_v58, %v564_v59 }
 0x114   : > { %v567_v63 = vmin.f32 %v565_v61, %v566_v62 }
 0x116   : > { %v568_v0 = vrot.slane %v567_v63, 4 }
 0x118   : > { %v569_v6 = vmin.f32 %v567_v63, %v568_v0 }
 0x11a   : > { %v570_v10 = vrot.slane %v569_v6, 2 }
 0x11c   : > { %v571_v12 = vmin.f32 %v569_v6, %v570_v10 }
 0x11e   : > { %v572_v16 = vrot.slane %v571_v12, 1 }
 0x120   : > { %v573_v37 = vmin.f32 %v571_v12, %v572_v16 }
 0x122   : > { %vm591_vm1 = vcmp.eq.f32.partialorder %v1684_v30, %v573_v37  ;;  %vm592_vm2 = vcmp.eq.f32.partialorder %v1678_v25, %v573_v37  ;;  %vm593_vm3 = vcmp.eq.f32.partialorder %v1686_v31, %v573_v37  ;;  %vm594_vm4 = vcmp.eq.f32.partialorder %v1694_v36, %v573_v37 }
 0x123   : > { %vm595_vm5 = vcmp.eq.f32.partialorder %v1680_v28, %v573_v37  ;;  %vm596_vm6 = vcmp.eq.f32.partialorder %v1682_v29, %v573_v37  ;;  %vm597_vm7 = vcmp.eq.f32.partialorder %v1692_v34, %v573_v37  ;;  %vm598_vm8 = vcmp.eq.f32.partialorder %v1702_v40, %v573_v37 }
 0x124   : > { %vm599_vm9 = vcmp.eq.f32.partialorder %v1704_v42, %v573_v37  ;;  %vm600_vm10 = vcmp.eq.f32.partialorder %v1688_v32, %v573_v37  ;;  %vm601_vm11 = vcmp.eq.f32.partialorder %v1698_v38, %v573_v37  ;;  %vm602_vm12 = vcmp.eq.f32.partialorder %v1713_v50, %v573_v37 }
 0x125   : > { %vm603_vm13 = vcmp.eq.f32.partialorder %v1715_v51, %v573_v37  ;;  %vm604_vm14 = vcmp.eq.f32.partialorder %v1707_v44, %v573_v37  ;;  %vm605_vm15 = vcmp.eq.f32.partialorder %v1717_v53, %v573_v37  ;;  %vm606_vm0 = vcmp.eq.f32.partialorder %v1719_v54, %v573_v37 }
 0x126   : > { %v607_v49 = vsel %vm591_vm1, %v1726_v7, 128  ;;  %v608_v52 = vsel %vm592_vm2, %v1729_v13, 128  ;;  %v609_v55 = vsel %vm593_vm3, %v1732_v17, 128  ;;  %v610_v56 = vsel %vm594_vm4, %v1735_v20, 128 }
 0x127   : > { %v611_v57 = vsel %vm595_vm5, %v1738_v21, 128  ;;  %v612_v30 = vsel %vm596_vm6, %v1741_v24, 128  ;;  %v613_v25 = vsel %vm597_vm7, %v1744_v26, 128  ;;  %v614_v31 = vsel %vm598_vm8, %v1747_v33, 128 }
 0x128   : > { %v615_v36 = vsel %vm599_vm9, %v1750_v35, 128  ;;  %v616_v28 = vsel %vm600_vm10, %v1753_v39, 128  ;;  %v617_v29 = vsel %vm601_vm11, %v1756_v41, 128  ;;  %v618_v34 = vsel %vm602_vm12, %v1759_v43, 128 }
 0x129   : > { %v619_v40 = vsel %vm603_vm13, %v1762_v45, 128  ;;  %v620_v42 = vsel %vm604_vm14, %v1765_v46, 128  ;;  %v621_v32 = vsel %vm605_vm15, %v1768_v47, 128  ;;  %v622_v38 = vsel %vm606_vm0, %v1771_v48, 128 }
 0x12a   : > { %vm623_vm1 = vcmp.lt.s32.totalorder %v607_v49, %v611_v57  ;;  %vm625_vm2 = vcmp.lt.s32.totalorder %v608_v52, %v612_v30  ;;  %vm627_vm3 = vcmp.lt.s32.totalorder %v609_v55, %v613_v25  ;;  %vm629_vm4 = vcmp.lt.s32.totalorder %v610_v56, %v614_v31 }
 0x12b   : > { %v624_v50 = vsel %vm623_vm1, %v607_v49, %v611_v57  ;;  %v626_v58 = vsel %vm625_vm2, %v608_v52, %v612_v30  ;;  %v628_v51 = vsel %vm627_vm3, %v609_v55, %v613_v25  ;;  %v630_v59 = vsel %vm629_vm4, %v610_v56, %v614_v31 }
 0x12c   : > { %vm631_vm5 = vcmp.lt.s32.totalorder %v624_v50, %v615_v36  ;;  %vm633_vm6 = vcmp.lt.s32.totalorder %v626_v58, %v616_v28  ;;  %vm635_vm7 = vcmp.lt.s32.totalorder %v628_v51, %v617_v29  ;;  %vm637_vm8 = vcmp.lt.s32.totalorder %v630_v59, %v618_v34 }
 0x12d   : > { %v632_v44 = vsel %vm631_vm5, %v624_v50, %v615_v36  ;;  %v634_v61 = vsel %vm633_vm6, %v626_v58, %v616_v28  ;;  %v636_v53 = vsel %vm635_vm7, %v628_v51, %v617_v29  ;;  %v638_v62 = vsel %vm637_vm8, %v630_v59, %v618_v34 }
 0x12e   : > { %vm639_vm9 = vcmp.lt.s32.totalorder %v632_v44, %v619_v40  ;;  %vm641_vm10 = vcmp.lt.s32.totalorder %v634_v61, %v620_v42  ;;  %vm643_vm11 = vcmp.lt.s32.totalorder %v636_v53, %v621_v32  ;;  %vm645_vm0 = vcmp.lt.s32.totalorder %v638_v62, %v622_v38 }
 0x12f   : > { %v640_v54 = vsel %vm639_vm9, %v632_v44, %v619_v40  ;;  %v642_v63 = vsel %vm641_vm10, %v634_v61, %v620_v42  ;;  %v644_v60 = vsel %vm643_vm11, %v636_v53, %v621_v32  ;;  %v646_v0 = vsel %vm645_vm0, %v638_v62, %v622_v38 }
 0x130   : > { %vm647_vm12 = vcmp.lt.s32.totalorder %v640_v54, %v642_v63  ;;  %vm649_vm13 = vcmp.lt.s32.totalorder %v644_v60, %v646_v0  ;;  %v1313_v30 = vmov 0.0  }
 0x131   : > { %v648_v6 = vsel %vm647_vm12, %v640_v54, %v642_v63  ;;  %v650_v10 = vsel %vm649_vm13, %v644_v60, %v646_v0 }
 0x132   : > { %vm651_vm14 = vcmp.lt.s32.totalorder %v648_v6, %v650_v10 }
 0x133   : > { %v652_v12 = vsel %vm651_vm14, %v648_v6, %v650_v10 }
 0x134   : > { %v653_v16 = vrot.slane %v652_v12, 4 }
 0x136   : > { %vm654_vm15 = vcmp.lt.s32.totalorder %v652_v12, %v653_v16 }
 0x137   : > { %v655_v37 = vsel %vm654_vm15, %v652_v12, %v653_v16 }
 0x138   : > { %v656_v49 = vrot.slane %v655_v37, 2 }
 0x13a   : > { %vm657_vm1 = vcmp.lt.s32.totalorder %v655_v37, %v656_v49 }
 0x13b   : > { %v658_v52 = vsel %vm657_vm1, %v655_v37, %v656_v49 }
 0x13c   : > { %v659_v55 = vrot.slane %v658_v52, 1 }
 0x13e   : > { %vm660_vm2 = vcmp.lt.s32.totalorder %v658_v52, %v659_v55 }
 0x13f   : > { %v661_v56 = vsel %vm660_vm2, %v658_v52, %v659_v55 }
 0x140   : > { %vm662_vm3 = vcmp.lt.s32.totalorder %v661_v56, 127 }
 0x141   : > { %v663_v57 = vsel %vm662_vm3, %v661_v56, 127 }
 0x142   : > { %vm665_vm4 = vcmp.eq.s32.totalorder %v1726_v7, %v663_v57  ;;  %664 = vst [vmem:[%s228_s10] sm:$0x1] %v663_v57  ;;  %vm666_vm5 = vcmp.eq.s32.totalorder %v1729_v13, %v663_v57  ;;  %vm673_vm6 = vcmp.eq.s32.totalorder %v1750_v35, %v663_v57  ;;  %vm674_vm7 = vcmp.eq.s32.totalorder %v1753_v39, %v663_v57 }
 0x143   : > { %v1084_v25 = vsel %vm665_vm4, 1.0, %v1313_v30  ;;  %vm675_vm8 = vcmp.eq.s32.totalorder %v1756_v41, %v663_v57  ;;  %vm676_vm9 = vcmp.eq.s32.totalorder %v1759_v43, %v663_v57  ;;  %v1092_v31 = vsel %vm673_vm6, 1.0, %v1313_v30 }
 0x144   : > { %713 = vxpose.xlu1.b32.start [1/16] %v1084_v25, 128  ;;  %v1093_v36 = vsel %vm674_vm7, 1.0, %v1313_v30  ;;  %v1094_v28 = vsel %vm675_vm8, 1.0, %v1313_v30  ;;  %v1095_v7 = vsel %vm676_vm9, 1.0, %v1313_v30  ;;  %vm677_vm10 = vcmp.eq.s32.totalorder %v1762_v45, %v663_v57 }
 0x145   : > { %vm678_vm11 = vcmp.eq.s32.totalorder %v1765_v46, %v663_v57  ;;  %vm679_vm0 = vcmp.eq.s32.totalorder %v1768_v47, %v663_v57  ;;  %vm680_vm12 = vcmp.eq.s32.totalorder %v1771_v48, %v663_v57  ;;  %v1096_v29 = vsel %vm677_vm10, 1.0, %v1313_v30 }
 0x146   : > { %v1097_v35 = vsel %vm678_vm11, 1.0, %v1313_v30  ;;  %v1098_v34 = vsel %vm679_vm0, 1.0, %v1313_v30  ;;  %v1099_v39 = vsel %vm680_vm12, 1.0, %v1313_v30  ;;  %v1085_v41 = vsel %vm666_vm5, 1.0, %v1313_v30 }
 0x147   : > { %vm667_vm13 = vcmp.eq.s32.totalorder %v1732_v17, %v663_v57  ;;  %vm668_vm14 = vcmp.eq.s32.totalorder %v1735_v20, %v663_v57  ;;  %vm669_vm15 = vcmp.eq.s32.totalorder %v1738_v21, %v663_v57  ;;  %vm670_vm1 = vcmp.eq.s32.totalorder %v1741_v24, %v663_v57 }
 0x148   : > { %v1086_v43 = vsel %vm667_vm13, 1.0, %v1313_v30  ;;  %v1087_v45 = vsel %vm668_vm14, 1.0, %v1313_v30  ;;  %v1088_v46 = vsel %vm669_vm15, 1.0, %v1313_v30  ;;  %v1089_v47 = vsel %vm670_vm1, 1.0, %v1313_v30 }
 0x149   : > { %vm671_vm2 = vcmp.eq.s32.totalorder %v1744_v26, %v663_v57  ;;  %vm672_vm3 = vcmp.eq.s32.totalorder %v1747_v33, %v663_v57  ;;  %vm1991_vm4 = vcmask 261120  }
 0x14a   : > { %v1090_v13 = vsel %vm671_vm2, 1.0, %v1313_v30  ;;  %v1091_v17 = vsel %vm672_vm3, 1.0, %v1313_v30  ;;  %vm1992_vm5 = vmmov %vm1991_vm4 }
 0x14b   : > { %vm1993_vm6 = vmmov %vm1991_vm4 }
 0x14c   : > { %714 = vxpose.xlu1.b32.cont [2/16] %v1085_v41, 128  ;;  %vm1994_vm7 = vmmov %vm1991_vm4 }
 0x154   : > { %715 = vxpose.xlu1.b32.cont [3/16] %v1086_v43, 128 }
 0x15c   : > { %716 = vxpose.xlu1.b32.cont [4/16] %v1087_v45, 128 }
 0x164   : > { %717 = vxpose.xlu1.b32.cont [5/16] %v1088_v46, 128 }
 0x16c   : > { %718 = vxpose.xlu1.b32.cont [6/16] %v1089_v47, 128 }
 0x174   : > { %719 = vxpose.xlu1.b32.cont [7/16] %v1090_v13, 128 }
 0x17c   : > { %720 = vxpose.xlu1.b32.cont [8/16] %v1091_v17, 128 }
 0x184   : > { %721 = vxpose.xlu1.b32.cont [9/16] %v1092_v31, 128 }
 0x18c   : > { %722 = vxpose.xlu1.b32.cont [10/16] %v1093_v36, 128 }
 0x194   : > { %723 = vxpose.xlu1.b32.cont [11/16] %v1094_v28, 128 }
 0x19c   : > { %724 = vxpose.xlu1.b32.cont [12/16] %v1095_v7, 128 }
 0x1a4   : > { %725 = vxpose.xlu1.b32.cont [13/16] %v1096_v29, 128 }
 0x1ac   : > { %726 = vxpose.xlu1.b32.cont [14/16] %v1097_v35, 128 }
 0x1b4   : > { %727 = vxpose.xlu1.b32.cont [15/16] %v1098_v34, 128 }
 0x1bc   : > { %728 = vxpose.xlu1.b32.end [16/16] %v1099_v39, 128 }
 0x1e8   : > { %v729_v20 = vpop.trf.xlu1 }
 0x1e9   : > { %761 = vmatmul.f32.vlgmr.msrb.gmra.mxu0 %v729_v20 }
 0x1f0   : > { %v730_v21 = vpop.trf.xlu1 }
 0x1f1   : > { %764 = vmatmul.f32.gmra.mxu0 %v730_v21 }
 0x1f8   : > { %v731_v24 = vpop.trf.xlu1 }
 0x1f9   : > { %767 = vmatmul.f32.vlgmr.msra.gmra.mxu1 %v731_v24 }
 0x200   : > { %v732_v26 = vpop.trf.xlu1 }
 0x201   : > { %770 = vmatmul.f32.gmra.mxu1 %v732_v26 }
 0x208   : > { %v733_v48 = vpop.trf.xlu1 }
 0x209   : > { %773 = vmatmul.f32.gmra.mxu1 %v733_v48 }
 0x210   : > { %v734_v33 = vpop.trf.xlu1 }
 0x211   : > { %776 = vmatmul.f32.gmra.mxu1 %v734_v33 }
 0x218   : > { %v735_v40 = vpop.trf.xlu1 }
 0x219   : > { %779 = vmatmul.f32.gmra.mxu1 %v735_v40 }
 0x220   : > { %v736_v42 = vpop.trf.xlu1 }
 0x221   : > { %782 = vmatmul.f32.gmra.mxu1 %v736_v42 }
 0x228   : > { %v737_v32 = vpop.trf.xlu1 }
 0x229   : > { %785 = vmatmul.f32.gmra.mxu1 %v737_v32 }
 0x230   : > { %v738_v38 = vpop.trf.xlu1 }
 0x231   : > { %788 = vmatmul.f32.gmra.mxu1 %v738_v38 }
 0x238   : > { %v739_v50 = vpop.trf.xlu1 }
 0x239   : > { %791 = vmatmul.f32.gmra.mxu1 %v739_v50 }
 0x240   : > { %v740_v58 = vpop.trf.xlu1 }
 0x241   : > { %794 = vmatmul.f32.gmra.mxu1 %v740_v58 }
 0x248   : > { %v741_v51 = vpop.trf.xlu1 }
 0x249   : > { %797 = vmatmul.f32.gmra.mxu1 %v741_v51 }
 0x250   : > { %v742_v59 = vpop.trf.xlu1 }
 0x251   : > { %800 = vmatmul.f32.vlgmr.msrb.gmra.mxu3 %v742_v59 }
 0x258   : > { %v743_v44 = vpop.trf.xlu1 }
 0x259   : > { %803 = vmatmul.f32.gmra.mxu3 %v743_v44 }
 0x260   : > { %v744_v61 = vpop.trf.xlu1 }
 0x261   : > { %806 = vmatmul.f32.gmra.mxu3 %v744_v61 }
 0x266   : > { %v762_v53 = vpop.f32.mrf.mxu0 }
 0x267   : > { %881 = vst.msk [vmem:[%s1866_s13] sm:$0xff] %vm1991_vm4, %v762_v53  ;;  %v810_v62 = vsub.f32 %v762_v53, %v1567_v27 }
 0x269   : > { %v826_v63 = vmul.f32 %v810_v62, %v810_v62 }
 0x26b   : > { %v842_v6 = vsel %vm1993_vm6, %v826_v63, 0.0 }
 0x26e   : > { %v765_v54 = vpop.f32.mrf.mxu0 }
 0x26f   : > { %v811_v60 = vsub.f32 %v765_v54, %v1549_v23  ;;  %882 = vst.msk [vmem:[%s1866_s13 + $0x8] sm:$0xff] %vm1992_vm5, %v765_v54 }
 0x271   : > { %v827_v0 = vmul.f32 %v811_v60, %v811_v60 }
 0x273   : > { %v843_v10 = vsel %vm1994_vm7, %v827_v0, 0.0 }
 0x274   : > { %v844_v27 = vadd.f32 %v843_v10, %v842_v6 }
 0x275   : > { %1243 = shalt.err (!%p1240_p3)
}
 0x276   : > { %1166 = dma.vmem_to_hbm [thread:$0]  (%p1382_p5), %s922_s15, 16, %s924_s16, %s903_s17   ;;  %v768_v23 = vpop.f32.mrf.mxu1  ;;  %vm1995_vm8 = vmmov %vm1991_vm4 }
 0x277   : > { %v812_v12 = vsub.f32 %v768_v23, %v1540_v22  ;;  %883 = vst.msk [vmem:[%s1866_s13 + $0x10] sm:$0xff] %vm1995_vm8, %v768_v23  ;;  %vm1996_vm9 = vmmov %vm1991_vm4  ;;  %s932_s6 = scalar_lea.hbm %s1987_s5, %s1365_s22  ;;  %s1264_s26 = scalar_lea.hbm %s1987_s5, 4 }
 0x278   : > { %vm1997_vm10 = vmmov %vm1991_vm4  ;;  %s936_s16 = sshll.u32 %s932_s6, 4  ;;  %s937_s16 = int_to_ptr.hbm [resolvable:$true] %s936_s16 }
 0x279   : > { %v828_v16 = vmul.f32 %v812_v12, %v812_v12  ;;  %vm1998_vm11 = vmmov %vm1991_vm4  ;;  %s1258_s17 = sshra.s32 %s937_s16, 4  ;;  %s1259_s17 = int_to_ptr.hbm [resolvable:$true] %s1258_s17 }
 0x27a   : > { %vm1999_vm0 = vmmov %vm1991_vm4  ;;  %s1260_s23 = scalar_lea.hbm %s1259_s17, 1  ;;  %p1265_p9 = scmp.lt.s32.totalorder %s1259_s17, %s1987_s5 }
 0x27b   : > { %v845_v37 = vsel %vm1996_vm9, %v828_v16, 0.0  ;;  %vm2000_vm12 = vmmov %vm1999_vm0  ;;  %p1261_p4 = scmp.ne.s32.totalorder %s1259_s17, %s1260_s23  ;;  %p1266_p10 = scmp.lt.s32.totalorder %s1264_s26, %s1260_s23 }
 0x27c   : > { %v846_v49 = vadd.f32 %v845_v37, %v844_v27  ;;  %vm2001_vm13 = vmmov %vm1999_vm0 }
 0x27d   : > { %vm2002_vm14 = vmmov %vm1999_vm0  ;;  %p1262_p7 = pnand %p1261_p4, %p1382_p5  ;;  %p1267_p11 = por %p1266_p10, %p1265_p9 }
 0x27e   : > { %v771_v52 = vpop.f32.mrf.mxu1  ;;  %vm2003_vm15 = vmmov %vm1999_vm0 }
 0x27f   : > { %v813_v55 = vsub.f32 %v771_v52, %v1525_v19  ;;  %884 = vst.msk [vmem:[%s1866_s13 + $0x18] sm:$0xff] %vm1997_vm10, %v771_v52  ;;  %vm2004_vm1 = vmmov %vm1999_vm0  ;;  %p1263_p8 = pneg %p1262_p7 }
 0x280   : > { %vm2005_vm2 = vmmov %vm1999_vm0 }
 0x281   : > { %v829_v56 = vmul.f32 %v813_v55, %v813_v55  ;;  %vm2006_vm3 = vmmov %vm1999_vm0  ;;  %p1268_p12 = pnand %p1267_p11, %p1263_p8 }
 0x282   : > { %vm2007_vm4 = vmmov %vm1999_vm0 }
 0x283   : > { %v847_v57 = vsel %vm1998_vm11, %v829_v56, 0.0  ;;  %vm2008_vm5 = vmmov %vm1999_vm0 }
 0x284   : > { %v848_v30 = vadd.f32 %v847_v57, %v846_v49  ;;  %vm2009_vm6 = vmmov %vm1999_vm0 }
 0x285   : > { %vm2010_vm7 = vmmov %vm1999_vm0 }
 0x286   : > { %v774_v25 = vpop.f32.mrf.mxu1  ;;  %vm2011_vm8 = vmmov %vm1999_vm0 }
 0x287   : > { %v814_v22 = vsub.f32 %v774_v25, %v1516_v18  ;;  %885 = vst.msk [vmem:[%s1866_s13 + $0x20] sm:$0xff] %vm1999_vm0, %v774_v25  ;;  %vm2012_vm9 = vmmov %vm1999_vm0 }
 0x288   : > { %vm2013_vm10 = vmmov %vm1999_vm0 }
 0x289   : > { %v830_v31 = vmul.f32 %v814_v22, %v814_v22  ;;  %vm2014_vm11 = vmmov %vm1999_vm0 }
 0x28b   : > { %v849_v36 = vsel %vm2000_vm12, %v830_v31, 0.0  ;;  %vm2015_vm12 = vmmov %vm1999_vm0 }
 0x28c   : > { %v850_v28 = vadd.f32 %v849_v36, %v848_v30 }
 0x28e   : > { %v777_v19 = vpop.f32.mrf.mxu1 }
 0x28f   : > { %v815_v7 = vsub.f32 %v777_v19, %v1501_v15  ;;  %886 = vst.msk [vmem:[%s1866_s13 + $0x28] sm:$0xff] %vm2001_vm13, %v777_v19  ;;  %vm2016_vm13 = vmmov %vm1999_vm0 }
 0x291   : > { %v831_v29 = vmul.f32 %v815_v7, %v815_v7 }
 0x293   : > { %v851_v35 = vsel %vm2002_vm14, %v831_v29, 0.0  ;;  %vm2017_vm14 = vmmov %vm1999_vm0 }
 0x294   : > { %v852_v18 = vadd.f32 %v851_v35, %v850_v28 }
 0x296   : > { %v780_v34 = vpop.f32.mrf.mxu1 }
 0x297   : > { %887 = vst.msk [vmem:[%s1866_s13 + $0x30] sm:$0xff] %vm2003_vm15, %v780_v34  ;;  %v816_v47 = vsub.f32 %v780_v34, %v1492_v14  ;;  %vm2018_vm15 = vmmov %vm1999_vm0 }
 0x299   : > { %v832_v17 = vmul.f32 %v816_v47, %v816_v47 }
 0x29b   : > { %v853_v48 = vsel %vm2010_vm7, %v832_v17, 0.0 }
 0x29c   : > { %v854_v32 = vadd.f32 %v853_v48, %v852_v18 }
 0x29e   : > { %v783_v39 = vpop.f32.mrf.mxu1 }
 0x29f   : > { %888 = vst.msk [vmem:[%s1866_s13 + $0x38] sm:$0xff] %vm2004_vm1, %v783_v39  ;;  %v817_v13 = vsub.f32 %v783_v39, %v1477_v11  ;;  %vm2019_vm1 = vmmov %vm1999_vm0 }
 0x2a1   : > { %v833_v21 = vmul.f32 %v817_v13, %v817_v13 }
 0x2a3   : > { %v855_v42 = vsel %vm2012_vm9, %v833_v21, 0.0 }
 0x2a4   : > { %v856_v50 = vadd.f32 %v855_v42, %v854_v32 }
 0x2a6   : > { %v786_v41 = vpop.f32.mrf.mxu1 }
 0x2a7   : > { %889 = vst.msk [vmem:[%s1866_s13 + $0x40] sm:$0xff] %vm2005_vm2, %v786_v41  ;;  %v818_v20 = vsub.f32 %v786_v41, %v1465_v9  ;;  %vm2020_vm2 = vmmov %vm1999_vm0 }
 0x2a9   : > { %v834_v33 = vmul.f32 %v818_v20, %v818_v20 }
 0x2ab   : > { %v857_v9 = vsel %vm2013_vm10, %v834_v33, 0.0 }
 0x2ac   : > { %v858_v59 = vadd.f32 %v857_v9, %v856_v50 }
 0x2ae   : > { %v789_v43 = vpop.f32.mrf.mxu1 }
 0x2af   : > { %890 = vst.msk [vmem:[%s1866_s13 + $0x48] sm:$0xff] %vm2006_vm3, %v789_v43  ;;  %v819_v24 = vsub.f32 %v789_v43, %v1456_v8  ;;  %vm2021_vm3 = vmmov %vm1999_vm0 }
 0x2b1   : > { %v835_v14 = vmul.f32 %v819_v24, %v819_v24 }
 0x2b3   : > { %v859_v58 = vsel %vm2014_vm11, %v835_v14, 0.0 }
 0x2b4   : > { %v860_v62 = vadd.f32 %v859_v58, %v858_v59 }
 0x2b6   : > { %v792_v15 = vpop.f32.mrf.mxu1 }
 0x2b7   : > { %891 = vst.msk [vmem:[%s1866_s13 + $0x50] sm:$0xff] %vm2007_vm4, %v792_v15  ;;  %v820_v40 = vsub.f32 %v792_v15, %v1444_v5  ;;  %vm879_vm4 = vcmask 253952  }
 0x2b9   : > { %v836_v38 = vmul.f32 %v820_v40, %v820_v40 }
 0x2bb   : > { %v861_v61 = vsel %vm1999_vm0, %v836_v38, 0.0 }
 0x2bc   : > { %v862_v63 = vadd.f32 %v861_v61, %v860_v62 }
 0x2be   : > { %v795_v45 = vpop.f32.mrf.mxu1 }
 0x2bf   : > { %892 = vst.msk [vmem:[%s1866_s13 + $0x58] sm:$0xff] %vm2008_vm5, %v795_v45  ;;  %v821_v11 = vsub.f32 %v795_v45, %v1435_v4 }
 0x2c1   : > { %v837_v51 = vmul.f32 %v821_v11, %v821_v11 }
 0x2c6   : > { %v798_v46 = vpop.f32.mrf.mxu1 }
 0x2c7   : > { %893 = vst.msk [vmem:[%s1866_s13 + $0x60] sm:$0xff] %vm2009_vm6, %v798_v46  ;;  %v822_v8 = vsub.f32 %v798_v46, %v1426_v3  ;;  %v863_v3 = vsel %vm2016_vm13, %v837_v51, 0.0 }
 0x2c9   : > { %v838_v53 = vmul.f32 %v822_v8, %v822_v8 }
 0x2cb   : > { %v865_v60 = vsel %vm2017_vm14, %v838_v53, 0.0 }
 0x2d4   : > { %v801_v26 = vpop.f32.mrf.mxu3 }
 0x2d5   : > { %894 = vst.msk [vmem:[%s1866_s13 + $0x68] sm:$0xff] %vm2011_vm8, %v801_v26  ;;  %v823_v5 = vsub.f32 %v801_v26, %v1417_v2  ;;  %v864_v2 = vadd.f32 %v863_v3, %v862_v63 }
 0x2d7   : > { %v839_v54 = vmul.f32 %v823_v5, %v823_v5  ;;  %v866_v10 = vadd.f32 %v865_v60, %v864_v2 }
 0x2d9   : > { %v867_v6 = vsel %vm2018_vm15, %v839_v54, 0.0 }
 0x2da   : > { %v868_v16 = vadd.f32 %v867_v6, %v866_v10 }
 0x2dc   : > { %v804_v44 = vpop.f32.mrf.mxu3 }
 0x2dd   : > { %v824_v4 = vsub.f32 %v804_v44, %v1408_v1  ;;  %895 = vst.msk [vmem:[%s1866_s13 + $0x70] sm:$0xff] %vm2015_vm12, %v804_v44  ;;  %v1215_v1 = vld [vmem:[%s1401_s9 + $0x78] sm:$0xff]  ;;  %s234_s9 = scalar_lea.vmem [#allocation4], %s1838_s8 }
 0x2de   : > { %s934_s15 = sshll.u32 %s234_s9, 4  ;;  %s935_s15 = int_to_ptr.vmem [resolvable:$true] %s934_s15 }
 0x2df   : > { %v840_v0 = vmul.f32 %v824_v4, %v824_v4 }
 0x2e1   : > { %v869_v23 = vsel %vm2019_vm1, %v840_v0, 0.0 }
 0x2e2   : > { %v870_v49 = vadd.f32 %v869_v23, %v868_v16 }
 0x2e4   : > { %v807_v27 = vpop.f32.mrf.mxu3 }
 0x2e5   : > { %v825_v12 = vsub.f32 %v807_v27, %v1215_v1  ;;  %896 = vst.msk [vmem:[%s1866_s13 + $0x78] sm:$0xff] %vm2020_vm2, %v807_v27  ;;  %s907_s13 = scalar_lea.sflag [#allocation5], %s1838_s8 }
 0x2e7   : > { %v841_v37 = vmul.f32 %v825_v12, %v825_v12 }
 0x2e9   : > { %v871_v52 = vsel %vm2021_vm3, %v841_v37, 0.0 }
 0x2ea   : > { %v872_v55 = vadd.f32 %v871_v52, %v870_v49 }
 0x2ec   : > { %v873_v56 = vrot.slane %v872_v55, 4 }
 0x2ee   : > { %v874_v57 = vadd.f32 %v873_v56, %v872_v55 }
 0x2f0   : > { %v875_v30 = vrot.slane %v874_v57, 2 }
 0x2f2   : > { %v876_v25 = vadd.f32 %v875_v30, %v874_v57 }
 0x2f4   : > { %v877_v22 = vrot.slane %v876_v25, 1 }
 0x2f6   : > { %v878_v31 = vadd.f32 %v877_v22, %v876_v25 }
 0x2f8   : > { %880 = vst.msk [vmem:[%s234_s9] sm:$0x1] %vm879_vm4, %v878_v31 }
 0x2f9   : > { %1271 = shalt.err (!%p1268_p12)
}
 0x2fa   : > { %1167 = dma.vmem_to_hbm [thread:$0]  (%p1382_p5), %s935_s15, 16, %s937_s16, %s907_s13  }
 0x2fb PF: > { %p1177_p13 = scmp.ge.s32.totalorder %s1310_s21, 2  ;;  %s956_s8 = sand.u32 1, %s1298_s18  }
 0x2fc   : > { %s957_s12 = scalar_lea.sflag [#allocation3], %s956_s8 }
 0x2fd   : > { %p1171_p0 = pnand %p1177_p13, %p1386_p6 }
 0x2ff   : > { %p1172_p1 = pneg %p1171_p0 }
 0x301   : > { %1289 = dma.done.wait (%p1172_p1), %s957_s12, 16  }
 0x302   : > { %1291 = vsyncadd (%p1172_p1), %s957_s12, 4294967280  ;;  %s966_s30 = scalar_lea.sflag [#allocation5], %s956_s8 }
 0x303   : > { %1293 = dma.done.wait (%p1172_p1), %s966_s30, 16  }
 0x304   : > { %1295 = vsyncadd (%p1172_p1), %s966_s30, 4294967280  ;;  %p19_p5 = scmp.ge.s32.totalorder %s1369_s24, 6   ;;  %s2022_s18 = smov %s1302_s19 }
 0x305   : > { %s2023_s19 = smov %s1306_s20  ;;  %s2024_s20 = smov %s1380_s27 }
 0x306   : > { %s2025_s21 = smov %s1369_s24  ;;  %21 = sbr.rel (!%p19_p5) target bundleno = 5 (0x5), region = 96 }
 0x30b   :  { %971 = vsyncpa [#allocation3], 1 }
 0x30c   :  { %973 = vsyncpa [#allocation3 + $0x1], 1 }
 0x30d   :  { %974 = vsyncpa [#allocation5], 1 }
 0x30e   :  { %976 = vsyncpa [#allocation5 + $0x1], 1 }

// kernel: tpu_custom_call.1
= control target key start
LH: loop header
LB: loop body
LE: loop exit
PB: predicated region body
PF: predicated region fallthrough
CT: control target
= control target key end

     0   :  { %11 = vsyncpa [#allocation3], 0  ;;  %s1982_s0 = inlined_call_operand.vmem [shape: f32[512,32], index: 0, kind: input, shape index: {}]   ;;  %s1983_s1 = inlined_call_operand.vmem [shape: f32[128,32], index: 1, kind: input, shape index: {}]   ;;  %s1984_s2 = inlined_call_operand.vmem [shape: f32[128,1], index: 2, kind: input, shape index: {}]   ;;  %s1985_s3 = inlined_call_operand.vmem [shape: f32[512,32], index: 3, kind: output, shape index: {0}]   ;;  %s1986_s4 = inlined_call_operand.hbm [shape: s32[4,1,128], index: 4, kind: output, shape index: {1}]   ;;  %s1987_s5 = inlined_call_operand.hbm [shape: f32[4,1,32], index: 5, kind: output, shape index: {2}]  }
   0x1   :  { %13 = vsyncpa [#allocation3 + $0x1], 0 }
   0x2   :  { %14 = vsyncpa [#allocation5], 0 }
   0x3   :  { %16 = vsyncpa [#allocation5 + $0x1], 0  ;;  %s1344_s18 = smov 0   ;;  %s1346_s19 = smov 0  }
   0x4   :  { %s1348_s20 = smov 0   ;;  %s1350_s21 = smov 0  }
   0x5 LB: > { %s1365_s22 = sadd.s32 4294967295, %s1310_s21   ;;  %s1044_s23 = sadd.s32 4294967294, %s1310_s21   ;;  %s1310_s21 = sphi %s1350_s21, %s2025_s21   ;;  %s1306_s20 = sphi %s1348_s20, %s2024_s20   ;;  %s1302_s19 = sphi %s1346_s19, %s2023_s19   ;;  %s1298_s18 = sphi %s1344_s18, %s2022_s18  }
   0x6   : > { %s1369_s24 = sadd.s32 1, %s1310_s21   ;;  %s123_s25 = sadd.s32 1, %s1306_s20 }
   0x7   : > { %s120_s26 = ssub.s32 %s1310_s21, %s1369_s24  ;;  %p133_p0 = scmp.ne.s32.totalorder %s1306_s20, %s1302_s19 }
   0x8   : > { %p121_p1 = scmp.eq.s32.totalorder %s120_s26, 0  ;;  %p134_p2 = scmp.eq.s32.totalorder %s1365_s22, 3 }
   0x9   : > { %p139_p3 = scmp.ne.s32.totalorder %s1302_s19, %s1298_s18  ;;  %p140_p4 = scmp.eq.s32.totalorder %s1044_s23, 3 }
   0xa   : > { %s1380_s27 = scalar_select %p121_p1, %s1306_s20, %s123_s25  }
   0xb   : > { %p1382_p5 = por %p134_p2, %p133_p0  ;;  %p1386_p6 = por %p140_p4, %p139_p3 }
   0xc   : > { %p1047_p7 = scmp.ge.s32.totalorder %s1310_s21, 1  ;;  %p199_p8 = scmp.lt.s32.totalorder %s1310_s21, 5 }
   0xe   : > { %p200_p9 = pnand %p1047_p7, %p199_p8 }
   0xf   : > { %s1048_s30 = sshll.u32 (!%p200_p9), %s1365_s22, 4  ;;  %s1838_s8 = sand.u32 (!%p200_p9), 1, %s1302_s19  }
  0x10   : > { %203 = sbr.rel (%p200_p9) target bundleno = 763 (0x2fb), region = 32  ;;  %p236_p10 = scmp.lt.s32.totalorder (!%p200_p9), %s1048_s30, 63 }
  0x11   : > { %s228_s10 = scalar_lea.vmem (!%p200_p9), [#allocation2], %s1838_s8  ;;  %s903_s17 = scalar_lea.sflag (!%p200_p9), [#allocation3], %s1838_s8 }
  0x12   : > { %s921_s15 = sshll.u32 (!%p200_p9), %s228_s10, 4  ;;  %s1236_s11 = scalar_lea.hbm (!%p200_p9), %s1986_s4, 4  ;;  %s922_s15 = int_to_ptr.vmem [resolvable:$true] %s921_s15 }
  0x15   : > { %s2027_s30 = smov (!%p236_p10, %s1048_s30), 63  ;;  %vm1988_vm0 = vcmask 261120   ;;  %v441_v6 = vld [vmem:[%s1984_s2] sm:$0xff]  ;;  %v1312_v7 = vmov 0   ;;  %v442_v10 = vld [vmem:[%s1984_s2 + $0x8] sm:$0xff]  ;;  %v443_v12 = vld [vmem:[%s1984_s2 + $0x10] sm:$0xff] }
  0x16   : > { %s1049_s6 = sshll.u32 %s2027_s30, 3  ;;  %1212 = vset.pattern.permute.xlu0 %v1312_v7  ;;  %1213 = vset.pattern.permute.xlu1 %v1312_v7  ;;  %v447_v13 = vld [vmem:[%s1984_s2 + $0x30] sm:$0xff]  ;;  %v444_v16 = vld [vmem:[%s1984_s2 + $0x18] sm:$0xff]  ;;  %v450_v17 = vld [vmem:[%s1984_s2 + $0x48] sm:$0xff] }
  0x17   : > { %s1401_s9 = scalar_lea.vmem %s1982_s0, %s1049_s6  ;;  %459 = vperm.xlu0 %1212, %v441_v6   ;;  %1214 = vset.pattern.permute.xlu2 %v1312_v7  ;;  %v448_v20 = vld [vmem:[%s1984_s2 + $0x38] sm:$0xff]  ;;  %v453_v21 = vld [vmem:[%s1984_s2 + $0x60] sm:$0xff]  ;;  %v451_v25 = vld [vmem:[%s1984_s2 + $0x50] sm:$0xff]  ;;  %s1866_s13 = scalar_lea.vmem %s1985_s3, %s1049_s6 }
  0x18   : > { %v262_v0 = vld [vmem:[%s1401_s9 + $0x78] sm:$0xff]  ;;  %v1408_v1 = vld [vmem:[%s1401_s9 + $0x70] sm:$0xff]  ;;  %v1417_v2 = vld [vmem:[%s1401_s9 + $0x68] sm:$0xff]  ;;  %469 = vperm.xlu1 %1213, %v443_v12   ;;  %s919_s6 = scalar_lea.hbm %s1986_s4, %s1365_s22 }
  0x19   : > { %1052 = vmatpush.xpose.msk.msra.mxu0 %vm1988_vm0, %v262_v0  ;;  %1102 = vmatpush.xpose.msk.msra.mxu2 %vm1988_vm0, %v262_v0  ;;  %v1426_v3 = vld [vmem:[%s1401_s9 + $0x60] sm:$0xff]  ;;  %v1435_v4 = vld [vmem:[%s1401_s9 + $0x58] sm:$0xff]  ;;  %v1444_v5 = vld [vmem:[%s1401_s9 + $0x50] sm:$0xff]  ;;  %s923_s16 = sshll.u32 %s919_s6, 4  ;;  %s924_s16 = int_to_ptr.hbm [resolvable:$true] %s923_s16 }
  0x1a   : > { %1103 = vmatpush.xpose.msk.msra.mxu3 %vm1988_vm0, %v262_v0  ;;  %v1456_v8 = vld [vmem:[%s1401_s9 + $0x48] sm:$0xff]  ;;  %v1465_v9 = vld [vmem:[%s1401_s9 + $0x40] sm:$0xff]  ;;  %v1477_v11 = vld [vmem:[%s1401_s9 + $0x38] sm:$0xff]  ;;  %s1230_s23 = sshra.s32 %s924_s16, 4  ;;  %s1231_s23 = int_to_ptr.hbm [resolvable:$true] %s1230_s23 }
  0x1b   : > { %v1492_v14 = vld [vmem:[%s1401_s9 + $0x30] sm:$0xff]  ;;  %v1501_v15 = vld [vmem:[%s1401_s9 + $0x28] sm:$0xff]  ;;  %v1516_v18 = vld [vmem:[%s1401_s9 + $0x20] sm:$0xff]  ;;  %s1232_s25 = scalar_lea.hbm %s1231_s23, 1  ;;  %p1237_p0 = scmp.lt.s32.totalorder %s1231_s23, %s1986_s4 }
  0x1c   : > { %v1525_v19 = vld [vmem:[%s1401_s9 + $0x18] sm:$0xff]  ;;  %v1540_v22 = vld [vmem:[%s1401_s9 + $0x10] sm:$0xff]  ;;  %v1549_v23 = vld [vmem:[%s1401_s9 + $0x8] sm:$0xff]  ;;  %p1233_p11 = scmp.ne.s32.totalorder %s1231_s23, %s1232_s25  ;;  %p1238_p1 = scmp.lt.s32.totalorder %s1236_s11, %s1232_s25 }
  0x1d   : > { %1053 = vmatpush.xpose.msk.msra.mxu0 %vm1988_vm0, %v1408_v1  ;;  %1104 = vmatpush.xpose.msk.msra.mxu2 %vm1988_vm0, %v1408_v1  ;;  %v445_v24 = vld [vmem:[%s1984_s2 + $0x20] sm:$0xff]  ;;  %v456_v26 = vld [vmem:[%s1984_s2 + $0x78] sm:$0xff]  ;;  %v1587_v30 = vld [vmem:[%s1983_s1 + $0x28] sm:$0xff] }
  0x1e   : > { %1105 = vmatpush.xpose.msk.msra.mxu3 %vm1988_vm0, %v1408_v1  ;;  %v1567_v27 = vld [vmem:[%s1401_s9] sm:$0xff]  ;;  %v1572_v28 = vld [vmem:[%s1983_s1 + $0x78] sm:$0xff]  ;;  %479 = vperm.xlu2 %1214, %v445_v24   ;;  %v277_v32 = vld [vmem:[%s1983_s1 + $0x70] sm:$0xff]  ;;  %p1234_p12 = pnand %p1233_p11, %p1382_p5  ;;  %p1239_p2 = por %p1238_p1, %p1237_p0 }
  0x1f   : > { %464 = vperm.xlu0 %1212, %v442_v10   ;;  %1134 = vmatpush.msra.mxu1 %v1572_v28  ;;  %v1582_v29 = vld [vmem:[%s1983_s1] sm:$0xff]  ;;  %v446_v33 = vld [vmem:[%s1984_s2 + $0x28] sm:$0xff]  ;;  %v269_v37 = vld [vmem:[%s1983_s1 + $0x30] sm:$0xff] }
  0x20   : > { %474 = vperm.xlu1 %1213, %v444_v16   ;;  %v275_v31 = vld [vmem:[%s1983_s1 + $0x60] sm:$0xff]  ;;  %v454_v34 = vld [vmem:[%s1984_s2 + $0x68] sm:$0xff]  ;;  %v274_v39 = vld [vmem:[%s1983_s1 + $0x58] sm:$0xff]  ;;  %p1235_p13 = pneg %p1234_p12 }
  0x21   : > { %1054 = vmatpush.xpose.msk.msra.mxu0 %vm1988_vm0, %v1417_v2  ;;  %1106 = vmatpush.xpose.msk.msra.mxu2 %vm1988_vm0, %v1417_v2  ;;  %v276_v35 = vld [vmem:[%s1983_s1 + $0x68] sm:$0xff]  ;;  %v449_v38 = vld [vmem:[%s1984_s2 + $0x40] sm:$0xff]  ;;  %v273_v40 = vld [vmem:[%s1983_s1 + $0x50] sm:$0xff] }
  0x22   : > { %1107 = vmatpush.xpose.msk.msra.mxu3 %vm1988_vm0, %v1417_v2  ;;  %1136 = vmatpush.msra.mxu1 %v277_v32  ;;  %v1616_v36 = vld [vmem:[%s1983_s1 + $0x8] sm:$0xff]  ;;  %v265_v42 = vld [vmem:[%s1983_s1 + $0x10] sm:$0xff]  ;;  %v270_v43 = vld [vmem:[%s1983_s1 + $0x38] sm:$0xff]  ;;  %p1240_p3 = pnand %p1239_p2, %p1235_p13 }
  0x23   : > { %v272_v41 = vld [vmem:[%s1983_s1 + $0x48] sm:$0xff]  ;;  %v271_v44 = vld [vmem:[%s1983_s1 + $0x40] sm:$0xff]  ;;  %v452_v45 = vld [vmem:[%s1984_s2 + $0x58] sm:$0xff] }
  0x24   : > { %1138 = vmatpush.msra.mxu1 %v276_v35  ;;  %v266_v46 = vld [vmem:[%s1983_s1 + $0x18] sm:$0xff]  ;;  %v267_v47 = vld [vmem:[%s1983_s1 + $0x20] sm:$0xff]  ;;  %v455_v48 = vld [vmem:[%s1984_s2 + $0x70] sm:$0xff] }
  0x25   : > { %1055 = vmatpush.xpose.msk.msra.mxu0 %vm1988_vm0, %v1426_v3  ;;  %1108 = vmatpush.xpose.msk.msra.mxu2 %vm1988_vm0, %v1426_v3 }
  0x26   : > { %1109 = vmatpush.xpose.msk.msra.mxu3 %vm1988_vm0, %v1426_v3  ;;  %484 = vperm.xlu2 %1214, %v446_v33  }
  0x27   : > { %489 = vperm.xlu0 %1212, %v447_v13   ;;  %1140 = vmatpush.msra.mxu1 %v275_v31 }
  0x28   : > { %494 = vperm.xlu1 %1213, %v448_v20  }
  0x29   : > { %1056 = vmatpush.xpose.msk.msra.mxu0 %vm1988_vm0, %v1435_v4  ;;  %1110 = vmatpush.xpose.msk.msra.mxu2 %vm1988_vm0, %v1435_v4 }
  0x2a   : > { %1111 = vmatpush.xpose.msk.msra.mxu3 %vm1988_vm0, %v1435_v4  ;;  %1142 = vmatpush.msra.mxu1 %v274_v39 }
  0x2c   : > { %1144 = vmatpush.msra.mxu1 %v273_v40 }
  0x2d   : > { %1057 = vmatpush.xpose.msk.msra.mxu0 %vm1988_vm0, %v1444_v5  ;;  %1112 = vmatpush.xpose.msk.msra.mxu2 %vm1988_vm0, %v1444_v5 }
  0x2e   : > { %1113 = vmatpush.xpose.msk.msra.mxu3 %vm1988_vm0, %v1444_v5  ;;  %499 = vperm.xlu2 %1214, %v449_v38  }
  0x2f   : > { %504 = vperm.xlu0 %1212, %v450_v17   ;;  %1146 = vmatpush.msra.mxu1 %v272_v41 }
  0x30   : > { %509 = vperm.xlu1 %1213, %v451_v25  }
  0x31   : > { %1058 = vmatpush.xpose.msk.msra.mxu0 %vm1988_vm0, %v1456_v8  ;;  %1114 = vmatpush.xpose.msk.msra.mxu2 %vm1988_vm0, %v1456_v8 }
  0x32   : > { %1115 = vmatpush.xpose.msk.msra.mxu3 %vm1988_vm0, %v1456_v8  ;;  %1148 = vmatpush.msra.mxu1 %v271_v44 }
  0x34   : > { %1150 = vmatpush.msra.mxu1 %v270_v43 }
  0x35   : > { %1059 = vmatpush.xpose.msk.msra.mxu0 %vm1988_vm0, %v1465_v9  ;;  %1116 = vmatpush.xpose.msk.msra.mxu2 %vm1988_vm0, %v1465_v9 }
  0x36   : > { %1117 = vmatpush.xpose.msk.msra.mxu3 %vm1988_vm0, %v1465_v9  ;;  %514 = vperm.xlu2 %1214, %v452_v45  }
  0x37   : > { %519 = vperm.xlu0 %1212, %v453_v21   ;;  %1152 = vmatpush.msra.mxu1 %v269_v37 }
  0x38   : > { %524 = vperm.xlu1 %1213, %v454_v34  }
  0x39   : > { %1060 = vmatpush.xpose.msk.msra.mxu0 %vm1988_vm0, %v1477_v11  ;;  %1118 = vmatpush.xpose.msk.msra.mxu2 %vm1988_vm0, %v1477_v11 }
  0x3a   : > { %1119 = vmatpush.xpose.msk.msra.mxu3 %vm1988_vm0, %v1477_v11  ;;  %1154 = vmatpush.msra.mxu1 %v1587_v30 }
  0x3c   : > { %1156 = vmatpush.msra.mxu1 %v267_v47 }
  0x3d   : > { %1061 = vmatpush.xpose.msk.msra.mxu0 %vm1988_vm0, %v1492_v14  ;;  %1120 = vmatpush.xpose.msk.msra.mxu2 %vm1988_vm0, %v1492_v14 }
  0x3e   : > { %1121 = vmatpush.xpose.msk.msra.mxu3 %vm1988_vm0, %v1492_v14  ;;  %529 = vperm.xlu2 %1214, %v455_v48  }
  0x3f   : > { %534 = vperm.xlu0 %1212, %v456_v26   ;;  %1158 = vmatpush.msra.mxu1 %v266_v46 }
  0x41   : > { %1062 = vmatpush.xpose.msk.msra.mxu0 %vm1988_vm0, %v1501_v15  ;;  %1122 = vmatpush.xpose.msk.msra.mxu2 %vm1988_vm0, %v1501_v15 }
  0x42   : > { %1123 = vmatpush.xpose.msk.msra.mxu3 %vm1988_vm0, %v1501_v15  ;;  %1160 = vmatpush.msra.mxu1 %v265_v42 }
  0x44   : > { %1162 = vmatpush.msra.mxu1 %v1616_v36 }
  0x45   : > { %1063 = vmatpush.xpose.msk.msra.mxu0 %vm1988_vm0, %v1516_v18  ;;  %1124 = vmatpush.xpose.msk.msra.mxu2 %vm1988_vm0, %v1516_v18 }
  0x46   : > { %1125 = vmatpush.xpose.msk.msra.mxu3 %vm1988_vm0, %v1516_v18  ;;  %1164 = vmatpush.msra.mxu1 %v1582_v29 }
  0x49   : > { %1064 = vmatpush.xpose.msk.msra.mxu0 %vm1988_vm0, %v1525_v19  ;;  %1126 = vmatpush.xpose.msk.msra.mxu2 %vm1988_vm0, %v1525_v19 }
  0x4a   : > { %1127 = vmatpush.xpose.msk.msra.mxu3 %vm1988_vm0, %v1525_v19 }
  0x4d   : > { %1065 = vmatpush.xpose.msk.msra.mxu0 %vm1988_vm0, %v1540_v22  ;;  %1128 = vmatpush.xpose.msk.msra.mxu2 %vm1988_vm0, %v1540_v22 }
  0x4e   : > { %1129 = vmatpush.xpose.msk.msra.mxu3 %vm1988_vm0, %v1540_v22 }
  0x51   : > { %1066 = vmatpush.xpose.msk.msra.mxu0 %vm1988_vm0, %v1549_v23  ;;  %1130 = vmatpush.xpose.msk.msra.mxu2 %vm1988_vm0, %v1549_v23 }
  0x52   : > { %1131 = vmatpush.xpose.msk.msra.mxu3 %vm1988_vm0, %v1549_v23 }
  0x55   : > { %1067 = vmatpush.xpose.msk.msra.mxu0 %vm1988_vm0, %v1567_v27  ;;  %1132 = vmatpush.xpose.msk.msra.mxu2 %vm1988_vm0, %v1567_v27 }
  0x56   : > { %1133 = vmatpush.xpose.msk.msra.mxu3 %vm1988_vm0, %v1567_v27 }
  0x58   : > { %1068 = vmatmul.msk.f32.vlgmr.msra.gmra.mxu0 %vm1988_vm0, %v1582_v29  ;;  %1073 = vmatmul.msk.f32.vlgmr.msra.gmra.mxu2 %vm1988_vm0, %v1587_v30 }
  0x59   : > { %745 = vmatpush.msrb.mxu0 %v1572_v28  ;;  %1080 = vmatmul.msk.f32.vlgmr.msra.gmra.mxu3 %vm1988_vm0, %v275_v31 }
  0x5a   : > { %1135 = vmatpush.msrb.mxu3 %v1572_v28 }
  0x5b   : > { %746 = vmatpush.msrb.mxu0 %v277_v32 }
  0x5c   : > { %1137 = vmatpush.msrb.mxu3 %v277_v32 }
  0x5d   : > { %747 = vmatpush.msrb.mxu0 %v276_v35 }
  0x5e   : > { %1139 = vmatpush.msrb.mxu3 %v276_v35 }
  0x5f   : > { %748 = vmatpush.msrb.mxu0 %v275_v31 }
  0x60   : > { %1069 = vmatmul.msk.f32.gmra.mxu0 %vm1988_vm0, %v1616_v36  ;;  %1074 = vmatmul.msk.f32.gmra.mxu2 %vm1988_vm0, %v269_v37 }
  0x61   : > { %1081 = vmatmul.msk.f32.gmra.mxu3 %vm1988_vm0, %v276_v35  ;;  %749 = vmatpush.msrb.mxu0 %v274_v39 }
  0x62   : > { %1141 = vmatpush.msrb.mxu3 %v275_v31 }
  0x63   : > { %750 = vmatpush.msrb.mxu0 %v273_v40 }
  0x64   : > { %1143 = vmatpush.msrb.mxu3 %v274_v39 }
  0x65   : > { %751 = vmatpush.msrb.mxu0 %v272_v41 }
  0x66   : > { %1145 = vmatpush.msrb.mxu3 %v273_v40 }
  0x67   : > { %752 = vmatpush.msrb.mxu0 %v271_v44 }
  0x68   : > { %1070 = vmatmul.msk.f32.gmra.mxu0 %vm1988_vm0, %v265_v42  ;;  %1075 = vmatmul.msk.f32.gmra.mxu2 %vm1988_vm0, %v270_v43 }
  0x69   : > { %1082 = vmatmul.msk.f32.gmra.mxu3 %vm1988_vm0, %v277_v32  ;;  %753 = vmatpush.msrb.mxu0 %v270_v43 }
  0x6a   : > { %1147 = vmatpush.msrb.mxu3 %v272_v41 }
  0x6b   : > { %754 = vmatpush.msrb.mxu0 %v269_v37 }
  0x6c   : > { %1149 = vmatpush.msrb.mxu3 %v271_v44 }
  0x6d   : > { %755 = vmatpush.msrb.mxu0 %v1587_v30 }
  0x6e   : > { %1151 = vmatpush.msrb.mxu3 %v270_v43 }
  0x6f   : > { %756 = vmatpush.msrb.mxu0 %v267_v47 }
  0x70   : > { %1071 = vmatmul.msk.f32.gmra.mxu0 %vm1988_vm0, %v266_v46  ;;  %1076 = vmatmul.msk.f32.gmra.mxu2 %vm1988_vm0, %v271_v44 }
  0x71   : > { %1083 = vmatmul.msk.f32.gmra.mxu3 %vm1988_vm0, %v1572_v28  ;;  %757 = vmatpush.msrb.mxu0 %v266_v46 }
  0x72   : > { %1153 = vmatpush.msrb.mxu3 %v269_v37 }
  0x73   : > { %758 = vmatpush.msrb.mxu0 %v265_v42 }
  0x74   : > { %1155 = vmatpush.msrb.mxu3 %v1587_v30 }
  0x75   : > { %759 = vmatpush.msrb.mxu0 %v1616_v36 }
  0x76   : > { %1157 = vmatpush.msrb.mxu3 %v267_v47 }
  0x77   : > { %760 = vmatpush.msrb.mxu0 %v1582_v29 }
  0x78   : > { %1072 = vmatmul.msk.f32.gmra.mxu0 %vm1988_vm0, %v267_v47  ;;  %1077 = vmatmul.msk.f32.gmra.mxu2 %vm1988_vm0, %v272_v41  ;;  %v480_v53 = vpop.permute.xlu2 %479 }
  0x79   : > { %1159 = vmatpush.msrb.mxu3 %v266_v46 }
  0x7b   : > { %1161 = vmatpush.msrb.mxu3 %v265_v42 }
  0x7d   : > { %1163 = vmatpush.msrb.mxu3 %v1616_v36 }
  0x7f   : > { %1165 = vmatpush.msrb.mxu3 %v1582_v29 }
  0x80   : > { %1078 = vmatmul.msk.f32.gmra.mxu2 %vm1988_vm0, %v273_v40  ;;  %v485_v59 = vpop.permute.xlu2 %484 }
  0x88   : > { %1079 = vmatmul.msk.f32.gmra.mxu2 %vm1988_vm0, %v274_v39  ;;  %v500_v6 = vpop.permute.xlu2 %499 }
  0x89   : > { %v460_v50 = vpop.permute.xlu0 %459 }
  0x8a   : > { %v470_v52 = vpop.permute.xlu1 %469 }
  0x90   : > { %v515_v17 = vpop.permute.xlu2 %514 }
  0x91   : > { %v465_v56 = vpop.permute.xlu0 %464 }
  0x92   : > { %v475_v57 = vpop.permute.xlu1 %474 }
  0x98   : > { %v530_v41 = vpop.permute.xlu2 %529 }
  0x99   : > { %v490_v62 = vpop.permute.xlu0 %489 }
  0x9a   : > { %v495_v0 = vpop.permute.xlu1 %494 }
  0xa1   : > { %v505_v12 = vpop.permute.xlu0 %504 }
  0xa2   : > { %v510_v16 = vpop.permute.xlu1 %509 }
  0xa9   : > { %v520_v24 = vpop.permute.xlu0 %519 }
  0xaa   : > { %v525_v35 = vpop.permute.xlu1 %524 }
  0xd5   : > { %v393_v49 = vpop.f32.mrf.mxu0 }
  0xd6   : > { %v1684_v30 = vsub.f32 %v460_v50, %v393_v49 }
  0xdb   : > { %v408_v51 = vpop.f32.mrf.mxu2 }
  0xdc   : > { %v429_v60 = vpop.f32.mrf.mxu3  ;;  %v1682_v29 = vsub.f32 %v485_v59, %v408_v51 }
  0xdd   : > { %v396_v54 = vpop.f32.mrf.mxu0  ;;  %v1715_v51 = vsub.f32 %v520_v24, %v429_v60  ;;  %v574_v60 = vlaneseq }
  0xde   : > { %v1678_v25 = vsub.f32 %v465_v56, %v396_v54 }
  0xe0   : > { %v554_v33 = vmin.f32 %v1678_v25, %v1682_v29 }
  0xe3   : > { %v411_v55 = vpop.f32.mrf.mxu2 }
  0xe4   : > { %v432_v7 = vpop.f32.mrf.mxu3  ;;  %v1692_v34 = vsub.f32 %v490_v62, %v411_v55 }
  0xe5   : > { %v399_v61 = vpop.f32.mrf.mxu0  ;;  %v1707_v44 = vsub.f32 %v525_v35, %v432_v7  ;;  %v1726_v7 = vshrl.u32 %v574_v60, 7 }
  0xe6   : > { %v1686_v31 = vsub.f32 %v470_v52, %v399_v61  ;;  %v535_v52 = vpop.permute.xlu0 %534 }
  0xe7   : > { %v1741_v24 = vadd.s32 40, %v1726_v7  ;;  %v1750_v35 = vadd.s32 64, %v1726_v7 }
  0xe8   : > { %v555_v39 = vmin.f32 %v1686_v31, %v1692_v34 }
  0xeb   : > { %v414_v58 = vpop.f32.mrf.mxu2 }
  0xec   : > { %v435_v20 = vpop.f32.mrf.mxu3  ;;  %v1702_v40 = vsub.f32 %v495_v0, %v414_v58 }
  0xed   : > { %v402_v10 = vpop.f32.mrf.mxu0 }
  0xee   : > { %v1694_v36 = vsub.f32 %v475_v57, %v402_v10 }
  0xf0   : > { %v556_v47 = vmin.f32 %v1694_v36, %v1702_v40 }
  0xf3   : > { %v417_v63 = vpop.f32.mrf.mxu2 }
  0xf4   : > { %v1704_v42 = vsub.f32 %v500_v6, %v417_v63  ;;  %v438_v45 = vpop.f32.mrf.mxu3 }
  0xf5   : > { %v405_v21 = vpop.f32.mrf.mxu0  ;;  %v1719_v54 = vsub.f32 %v535_v52, %v438_v45  ;;  %v1762_v45 = vadd.s32 96, %v1726_v7 }
  0xf6   : > { %v1680_v28 = vsub.f32 %v480_v53, %v405_v21  ;;  %v1717_v53 = vsub.f32 %v530_v41, %v435_v20  ;;  %v1735_v20 = vadd.s32 24, %v1726_v7  ;;  %v1738_v21 = vadd.s32 32, %v1726_v7 }
  0xf7   : > { %v1756_v41 = vadd.s32 80, %v1726_v7 }
  0xf8   : > { %v553_v37 = vmin.f32 %v1684_v30, %v1680_v28 }
  0xfa   : > { %v557_v48 = vmin.f32 %v553_v37, %v1704_v42 }
  0xfb   : > { %v420_v13 = vpop.f32.mrf.mxu2 }
  0xfc   : > { %v1688_v32 = vsub.f32 %v505_v12, %v420_v13  ;;  %v561_v57 = vmin.f32 %v557_v48, %v1715_v51  ;;  %v1729_v13 = vadd.s32 8, %v1726_v7  ;;  %v1771_v48 = vadd.s32 120, %v1726_v7 }
  0xfe   : > { %v558_v43 = vmin.f32 %v554_v33, %v1688_v32  ;;  %v1747_v33 = vadd.s32 56, %v1726_v7 }
 0x100   : > { %v562_v55 = vmin.f32 %v558_v43, %v1707_v44  ;;  %v1759_v43 = vadd.s32 88, %v1726_v7 }
 0x102   : > { %v565_v61 = vmin.f32 %v561_v57, %v562_v55 }
 0x103   : > { %v423_v26 = vpop.f32.mrf.mxu2 }
 0x104   : > { %v1698_v38 = vsub.f32 %v510_v16, %v423_v26  ;;  %v1744_v26 = vadd.s32 48, %v1726_v7 }
 0x106   : > { %v559_v49 = vmin.f32 %v555_v39, %v1698_v38  ;;  %v1753_v39 = vadd.s32 72, %v1726_v7 }
 0x108   : > { %v563_v58 = vmin.f32 %v559_v49, %v1717_v53 }
 0x10b   : > { %v426_v46 = vpop.f32.mrf.mxu2 }
 0x10c   : > { %v1713_v50 = vsub.f32 %v515_v17, %v426_v46  ;;  %v1732_v17 = vadd.s32 16, %v1726_v7  ;;  %v1765_v46 = vadd.s32 104, %v1726_v7 }
 0x10e   : > { %v560_v56 = vmin.f32 %v556_v47, %v1713_v50  ;;  %v1768_v47 = vadd.s32 112, %v1726_v7 }
 0x110   : > { %v564_v59 = vmin.f32 %v560_v56, %v1719_v54 }
 0x112   : > { %v566_v62 = vmin.f32 %v563_v58, %v564_v59 }
 0x114   : > { %v567_v63 = vmin.f32 %v565_v61, %v566_v62 }
 0x116   : > { %v568_v0 = vrot.slane %v567_v63, 4 }
 0x118   : > { %v569_v6 = vmin.f32 %v567_v63, %v568_v0 }
 0x11a   : > { %v570_v10 = vrot.slane %v569_v6, 2 }
 0x11c   : > { %v571_v12 = vmin.f32 %v569_v6, %v570_v10 }
 0x11e   : > { %v572_v16 = vrot.slane %v571_v12, 1 }
 0x120   : > { %v573_v37 = vmin.f32 %v571_v12, %v572_v16 }
 0x122   : > { %vm591_vm1 = vcmp.eq.f32.partialorder %v1684_v30, %v573_v37  ;;  %vm592_vm2 = vcmp.eq.f32.partialorder %v1678_v25, %v573_v37  ;;  %vm593_vm3 = vcmp.eq.f32.partialorder %v1686_v31, %v573_v37  ;;  %vm594_vm4 = vcmp.eq.f32.partialorder %v1694_v36, %v573_v37 }
 0x123   : > { %vm595_vm5 = vcmp.eq.f32.partialorder %v1680_v28, %v573_v37  ;;  %vm596_vm6 = vcmp.eq.f32.partialorder %v1682_v29, %v573_v37  ;;  %vm597_vm7 = vcmp.eq.f32.partialorder %v1692_v34, %v573_v37  ;;  %vm598_vm8 = vcmp.eq.f32.partialorder %v1702_v40, %v573_v37 }
 0x124   : > { %vm599_vm9 = vcmp.eq.f32.partialorder %v1704_v42, %v573_v37  ;;  %vm600_vm10 = vcmp.eq.f32.partialorder %v1688_v32, %v573_v37  ;;  %vm601_vm11 = vcmp.eq.f32.partialorder %v1698_v38, %v573_v37  ;;  %vm602_vm12 = vcmp.eq.f32.partialorder %v1713_v50, %v573_v37 }
 0x125   : > { %vm603_vm13 = vcmp.eq.f32.partialorder %v1715_v51, %v573_v37  ;;  %vm604_vm14 = vcmp.eq.f32.partialorder %v1707_v44, %v573_v37  ;;  %vm605_vm15 = vcmp.eq.f32.partialorder %v1717_v53, %v573_v37  ;;  %vm606_vm0 = vcmp.eq.f32.partialorder %v1719_v54, %v573_v37 }
 0x126   : > { %v607_v49 = vsel %vm591_vm1, %v1726_v7, 128  ;;  %v608_v52 = vsel %vm592_vm2, %v1729_v13, 128  ;;  %v609_v55 = vsel %vm593_vm3, %v1732_v17, 128  ;;  %v610_v56 = vsel %vm594_vm4, %v1735_v20, 128 }
 0x127   : > { %v611_v57 = vsel %vm595_vm5, %v1738_v21, 128  ;;  %v612_v30 = vsel %vm596_vm6, %v1741_v24, 128  ;;  %v613_v25 = vsel %vm597_vm7, %v1744_v26, 128  ;;  %v614_v31 = vsel %vm598_vm8, %v1747_v33, 128 }
 0x128   : > { %v615_v36 = vsel %vm599_vm9, %v1750_v35, 128  ;;  %v616_v28 = vsel %vm600_vm10, %v1753_v39, 128  ;;  %v617_v29 = vsel %vm601_vm11, %v1756_v41, 128  ;;  %v618_v34 = vsel %vm602_vm12, %v1759_v43, 128 }
 0x129   : > { %v619_v40 = vsel %vm603_vm13, %v1762_v45, 128  ;;  %v620_v42 = vsel %vm604_vm14, %v1765_v46, 128  ;;  %v621_v32 = vsel %vm605_vm15, %v1768_v47, 128  ;;  %v622_v38 = vsel %vm606_vm0, %v1771_v48, 128 }
 0x12a   : > { %vm623_vm1 = vcmp.lt.s32.totalorder %v607_v49, %v611_v57  ;;  %vm625_vm2 = vcmp.lt.s32.totalorder %v608_v52, %v612_v30  ;;  %vm627_vm3 = vcmp.lt.s32.totalorder %v609_v55, %v613_v25  ;;  %vm629_vm4 = vcmp.lt.s32.totalorder %v610_v56, %v614_v31 }
 0x12b   : > { %v624_v50 = vsel %vm623_vm1, %v607_v49, %v611_v57  ;;  %v626_v58 = vsel %vm625_vm2, %v608_v52, %v612_v30  ;;  %v628_v51 = vsel %vm627_vm3, %v609_v55, %v613_v25  ;;  %v630_v59 = vsel %vm629_vm4, %v610_v56, %v614_v31 }
 0x12c   : > { %vm631_vm5 = vcmp.lt.s32.totalorder %v624_v50, %v615_v36  ;;  %vm633_vm6 = vcmp.lt.s32.totalorder %v626_v58, %v616_v28  ;;  %vm635_vm7 = vcmp.lt.s32.totalorder %v628_v51, %v617_v29  ;;  %vm637_vm8 = vcmp.lt.s32.totalorder %v630_v59, %v618_v34 }
 0x12d   : > { %v632_v44 = vsel %vm631_vm5, %v624_v50, %v615_v36  ;;  %v634_v61 = vsel %vm633_vm6, %v626_v58, %v616_v28  ;;  %v636_v53 = vsel %vm635_vm7, %v628_v51, %v617_v29  ;;  %v638_v62 = vsel %vm637_vm8, %v630_v59, %v618_v34 }
 0x12e   : > { %vm639_vm9 = vcmp.lt.s32.totalorder %v632_v44, %v619_v40  ;;  %vm641_vm10 = vcmp.lt.s32.totalorder %v634_v61, %v620_v42  ;;  %vm643_vm11 = vcmp.lt.s32.totalorder %v636_v53, %v621_v32  ;;  %vm645_vm0 = vcmp.lt.s32.totalorder %v638_v62, %v622_v38 }
 0x12f   : > { %v640_v54 = vsel %vm639_vm9, %v632_v44, %v619_v40  ;;  %v642_v63 = vsel %vm641_vm10, %v634_v61, %v620_v42  ;;  %v644_v60 = vsel %vm643_vm11, %v636_v53, %v621_v32  ;;  %v646_v0 = vsel %vm645_vm0, %v638_v62, %v622_v38 }
 0x130   : > { %vm647_vm12 = vcmp.lt.s32.totalorder %v640_v54, %v642_v63  ;;  %vm649_vm13 = vcmp.lt.s32.totalorder %v644_v60, %v646_v0  ;;  %v1313_v30 = vmov 0.0  }
 0x131   : > { %v648_v6 = vsel %vm647_vm12, %v640_v54, %v642_v63  ;;  %v650_v10 = vsel %vm649_vm13, %v644_v60, %v646_v0 }
 0x132   : > { %vm651_vm14 = vcmp.lt.s32.totalorder %v648_v6, %v650_v10 }
 0x133   : > { %v652_v12 = vsel %vm651_vm14, %v648_v6, %v650_v10 }
 0x134   : > { %v653_v16 = vrot.slane %v652_v12, 4 }
 0x136   : > { %vm654_vm15 = vcmp.lt.s32.totalorder %v652_v12, %v653_v16 }
 0x137   : > { %v655_v37 = vsel %vm654_vm15, %v652_v12, %v653_v16 }
 0x138   : > { %v656_v49 = vrot.slane %v655_v37, 2 }
 0x13a   : > { %vm657_vm1 = vcmp.lt.s32.totalorder %v655_v37, %v656_v49 }
 0x13b   : > { %v658_v52 = vsel %vm657_vm1, %v655_v37, %v656_v49 }
 0x13c   : > { %v659_v55 = vrot.slane %v658_v52, 1 }
 0x13e   : > { %vm660_vm2 = vcmp.lt.s32.totalorder %v658_v52, %v659_v55 }
 0x13f   : > { %v661_v56 = vsel %vm660_vm2, %v658_v52, %v659_v55 }
 0x140   : > { %vm662_vm3 = vcmp.lt.s32.totalorder %v661_v56, 127 }
 0x141   : > { %v663_v57 = vsel %vm662_vm3, %v661_v56, 127 }
 0x142   : > { %vm665_vm4 = vcmp.eq.s32.totalorder %v1726_v7, %v663_v57  ;;  %664 = vst [vmem:[%s228_s10] sm:$0x1] %v663_v57  ;;  %vm666_vm5 = vcmp.eq.s32.totalorder %v1729_v13, %v663_v57  ;;  %vm673_vm6 = vcmp.eq.s32.totalorder %v1750_v35, %v663_v57  ;;  %vm674_vm7 = vcmp.eq.s32.totalorder %v1753_v39, %v663_v57 }
 0x143   : > { %v1084_v25 = vsel %vm665_vm4, 1.0, %v1313_v30  ;;  %vm675_vm8 = vcmp.eq.s32.totalorder %v1756_v41, %v663_v57  ;;  %vm676_vm9 = vcmp.eq.s32.totalorder %v1759_v43, %v663_v57  ;;  %v1092_v31 = vsel %vm673_vm6, 1.0, %v1313_v30 }
 0x144   : > { %713 = vxpose.xlu1.b32.start [1/16] %v1084_v25, 128  ;;  %v1093_v36 = vsel %vm674_vm7, 1.0, %v1313_v30  ;;  %v1094_v28 = vsel %vm675_vm8, 1.0, %v1313_v30  ;;  %v1095_v7 = vsel %vm676_vm9, 1.0, %v1313_v30  ;;  %vm677_vm10 = vcmp.eq.s32.totalorder %v1762_v45, %v663_v57 }
 0x145   : > { %vm678_vm11 = vcmp.eq.s32.totalorder %v1765_v46, %v663_v57  ;;  %vm679_vm0 = vcmp.eq.s32.totalorder %v1768_v47, %v663_v57  ;;  %vm680_vm12 = vcmp.eq.s32.totalorder %v1771_v48, %v663_v57  ;;  %v1096_v29 = vsel %vm677_vm10, 1.0, %v1313_v30 }
 0x146   : > { %v1097_v35 = vsel %vm678_vm11, 1.0, %v1313_v30  ;;  %v1098_v34 = vsel %vm679_vm0, 1.0, %v1313_v30  ;;  %v1099_v39 = vsel %vm680_vm12, 1.0, %v1313_v30  ;;  %v1085_v41 = vsel %vm666_vm5, 1.0, %v1313_v30 }
 0x147   : > { %vm667_vm13 = vcmp.eq.s32.totalorder %v1732_v17, %v663_v57  ;;  %vm668_vm14 = vcmp.eq.s32.totalorder %v1735_v20, %v663_v57  ;;  %vm669_vm15 = vcmp.eq.s32.totalorder %v1738_v21, %v663_v57  ;;  %vm670_vm1 = vcmp.eq.s32.totalorder %v1741_v24, %v663_v57 }
 0x148   : > { %v1086_v43 = vsel %vm667_vm13, 1.0, %v1313_v30  ;;  %v1087_v45 = vsel %vm668_vm14, 1.0, %v1313_v30  ;;  %v1088_v46 = vsel %vm669_vm15, 1.0, %v1313_v30  ;;  %v1089_v47 = vsel %vm670_vm1, 1.0, %v1313_v30 }
 0x149   : > { %vm671_vm2 = vcmp.eq.s32.totalorder %v1744_v26, %v663_v57  ;;  %vm672_vm3 = vcmp.eq.s32.totalorder %v1747_v33, %v663_v57  ;;  %vm1991_vm4 = vcmask 261120  }
 0x14a   : > { %v1090_v13 = vsel %vm671_vm2, 1.0, %v1313_v30  ;;  %v1091_v17 = vsel %vm672_vm3, 1.0, %v1313_v30  ;;  %vm1992_vm5 = vmmov %vm1991_vm4 }
 0x14b   : > { %vm1993_vm6 = vmmov %vm1991_vm4 }
 0x14c   : > { %714 = vxpose.xlu1.b32.cont [2/16] %v1085_v41, 128  ;;  %vm1994_vm7 = vmmov %vm1991_vm4 }
 0x154   : > { %715 = vxpose.xlu1.b32.cont [3/16] %v1086_v43, 128 }
 0x15c   : > { %716 = vxpose.xlu1.b32.cont [4/16] %v1087_v45, 128 }
 0x164   : > { %717 = vxpose.xlu1.b32.cont [5/16] %v1088_v46, 128 }
 0x16c   : > { %718 = vxpose.xlu1.b32.cont [6/16] %v1089_v47, 128 }
 0x174   : > { %719 = vxpose.xlu1.b32.cont [7/16] %v1090_v13, 128 }
 0x17c   : > { %720 = vxpose.xlu1.b32.cont [8/16] %v1091_v17, 128 }
 0x184   : > { %721 = vxpose.xlu1.b32.cont [9/16] %v1092_v31, 128 }
 0x18c   : > { %722 = vxpose.xlu1.b32.cont [10/16] %v1093_v36, 128 }
 0x194   : > { %723 = vxpose.xlu1.b32.cont [11/16] %v1094_v28, 128 }
 0x19c   : > { %724 = vxpose.xlu1.b32.cont [12/16] %v1095_v7, 128 }
 0x1a4   : > { %725 = vxpose.xlu1.b32.cont [13/16] %v1096_v29, 128 }
 0x1ac   : > { %726 = vxpose.xlu1.b32.cont [14/16] %v1097_v35, 128 }
 0x1b4   : > { %727 = vxpose.xlu1.b32.cont [15/16] %v1098_v34, 128 }
 0x1bc   : > { %728 = vxpose.xlu1.b32.end [16/16] %v1099_v39, 128 }
 0x1e8   : > { %v729_v20 = vpop.trf.xlu1 }
 0x1e9   : > { %761 = vmatmul.f32.vlgmr.msrb.gmra.mxu0 %v729_v20 }
 0x1f0   : > { %v730_v21 = vpop.trf.xlu1 }
 0x1f1   : > { %764 = vmatmul.f32.gmra.mxu0 %v730_v21 }
 0x1f8   : > { %v731_v24 = vpop.trf.xlu1 }
 0x1f9   : > { %767 = vmatmul.f32.vlgmr.msra.gmra.mxu1 %v731_v24 }
 0x200   : > { %v732_v26 = vpop.trf.xlu1 }
 0x201   : > { %770 = vmatmul.f32.gmra.mxu1 %v732_v26 }
 0x208   : > { %v733_v48 = vpop.trf.xlu1 }
 0x209   : > { %773 = vmatmul.f32.gmra.mxu1 %v733_v48 }
 0x210   : > { %v734_v33 = vpop.trf.xlu1 }
 0x211   : > { %776 = vmatmul.f32.gmra.mxu1 %v734_v33 }
 0x218   : > { %v735_v40 = vpop.trf.xlu1 }
 0x219   : > { %779 = vmatmul.f32.gmra.mxu1 %v735_v40 }
 0x220   : > { %v736_v42 = vpop.trf.xlu1 }
 0x221   : > { %782 = vmatmul.f32.gmra.mxu1 %v736_v42 }
 0x228   : > { %v737_v32 = vpop.trf.xlu1 }
 0x229   : > { %785 = vmatmul.f32.gmra.mxu1 %v737_v32 }
 0x230   : > { %v738_v38 = vpop.trf.xlu1 }
 0x231   : > { %788 = vmatmul.f32.gmra.mxu1 %v738_v38 }
 0x238   : > { %v739_v50 = vpop.trf.xlu1 }
 0x239   : > { %791 = vmatmul.f32.gmra.mxu1 %v739_v50 }
 0x240   : > { %v740_v58 = vpop.trf.xlu1 }
 0x241   : > { %794 = vmatmul.f32.gmra.mxu1 %v740_v58 }
 0x248   : > { %v741_v51 = vpop.trf.xlu1 }
 0x249   : > { %797 = vmatmul.f32.gmra.mxu1 %v741_v51 }
 0x250   : > { %v742_v59 = vpop.trf.xlu1 }
 0x251   : > { %800 = vmatmul.f32.vlgmr.msrb.gmra.mxu3 %v742_v59 }
 0x258   : > { %v743_v44 = vpop.trf.xlu1 }
 0x259   : > { %803 = vmatmul.f32.gmra.mxu3 %v743_v44 }
 0x260   : > { %v744_v61 = vpop.trf.xlu1 }
 0x261   : > { %806 = vmatmul.f32.gmra.mxu3 %v744_v61 }
 0x266   : > { %v762_v53 = vpop.f32.mrf.mxu0 }
 0x267   : > { %881 = vst.msk [vmem:[%s1866_s13] sm:$0xff] %vm1991_vm4, %v762_v53  ;;  %v810_v62 = vsub.f32 %v762_v53, %v1567_v27 }
 0x269   : > { %v826_v63 = vmul.f32 %v810_v62, %v810_v62 }
 0x26b   : > { %v842_v6 = vsel %vm1993_vm6, %v826_v63, 0.0 }
 0x26e   : > { %v765_v54 = vpop.f32.mrf.mxu0 }
 0x26f   : > { %v811_v60 = vsub.f32 %v765_v54, %v1549_v23  ;;  %882 = vst.msk [vmem:[%s1866_s13 + $0x8] sm:$0xff] %vm1992_vm5, %v765_v54 }
 0x271   : > { %v827_v0 = vmul.f32 %v811_v60, %v811_v60 }
 0x273   : > { %v843_v10 = vsel %vm1994_vm7, %v827_v0, 0.0 }
 0x274   : > { %v844_v27 = vadd.f32 %v843_v10, %v842_v6 }
 0x275   : > { %1243 = shalt.err (!%p1240_p3)
}
 0x276   : > { %1166 = dma.vmem_to_hbm [thread:$0]  (%p1382_p5), %s922_s15, 16, %s924_s16, %s903_s17   ;;  %v768_v23 = vpop.f32.mrf.mxu1  ;;  %vm1995_vm8 = vmmov %vm1991_vm4 }
 0x277   : > { %v812_v12 = vsub.f32 %v768_v23, %v1540_v22  ;;  %883 = vst.msk [vmem:[%s1866_s13 + $0x10] sm:$0xff] %vm1995_vm8, %v768_v23  ;;  %vm1996_vm9 = vmmov %vm1991_vm4  ;;  %s932_s6 = scalar_lea.hbm %s1987_s5, %s1365_s22  ;;  %s1264_s26 = scalar_lea.hbm %s1987_s5, 4 }
 0x278   : > { %vm1997_vm10 = vmmov %vm1991_vm4  ;;  %s936_s16 = sshll.u32 %s932_s6, 4  ;;  %s937_s16 = int_to_ptr.hbm [resolvable:$true] %s936_s16 }
 0x279   : > { %v828_v16 = vmul.f32 %v812_v12, %v812_v12  ;;  %vm1998_vm11 = vmmov %vm1991_vm4  ;;  %s1258_s17 = sshra.s32 %s937_s16, 4  ;;  %s1259_s17 = int_to_ptr.hbm [resolvable:$true] %s1258_s17 }
 0x27a   : > { %vm1999_vm0 = vmmov %vm1991_vm4  ;;  %s1260_s23 = scalar_lea.hbm %s1259_s17, 1  ;;  %p1265_p9 = scmp.lt.s32.totalorder %s1259_s17, %s1987_s5 }
 0x27b   : > { %v845_v37 = vsel %vm1996_vm9, %v828_v16, 0.0  ;;  %vm2000_vm12 = vmmov %vm1999_vm0  ;;  %p1261_p4 = scmp.ne.s32.totalorder %s1259_s17, %s1260_s23  ;;  %p1266_p10 = scmp.lt.s32.totalorder %s1264_s26, %s1260_s23 }
 0x27c   : > { %v846_v49 = vadd.f32 %v845_v37, %v844_v27  ;;  %vm2001_vm13 = vmmov %vm1999_vm0 }
 0x27d   : > { %vm2002_vm14 = vmmov %vm1999_vm0  ;;  %p1262_p7 = pnand %p1261_p4, %p1382_p5  ;;  %p1267_p11 = por %p1266_p10, %p1265_p9 }
 0x27e   : > { %v771_v52 = vpop.f32.mrf.mxu1  ;;  %vm2003_vm15 = vmmov %vm1999_vm0 }
 0x27f   : > { %v813_v55 = vsub.f32 %v771_v52, %v1525_v19  ;;  %884 = vst.msk [vmem:[%s1866_s13 + $0x18] sm:$0xff] %vm1997_vm10, %v771_v52  ;;  %vm2004_vm1 = vmmov %vm1999_vm0  ;;  %p1263_p8 = pneg %p1262_p7 }
 0x280   : > { %vm2005_vm2 = vmmov %vm1999_vm0 }
 0x281   : > { %v829_v56 = vmul.f32 %v813_v55, %v813_v55  ;;  %vm2006_vm3 = vmmov %vm1999_vm0  ;;  %p1268_p12 = pnand %p1267_p11, %p1263_p8 }
 0x282   : > { %vm2007_vm4 = vmmov %vm1999_vm0 }
 0x283   : > { %v847_v57 = vsel %vm1998_vm11, %v829_v56, 0.0  ;;  %vm2008_vm5 = vmmov %vm1999_vm0 }
 0x284   : > { %v848_v30 = vadd.f32 %v847_v57, %v846_v49  ;;  %vm2009_vm6 = vmmov %vm1999_vm0 }
 0x285   : > { %vm2010_vm7 = vmmov %vm1999_vm0 }
 0x286   : > { %v774_v25 = vpop.f32.mrf.mxu1  ;;  %vm2011_vm8 = vmmov %vm1999_vm0 }
 0x287   : > { %v814_v22 = vsub.f32 %v774_v25, %v1516_v18  ;;  %885 = vst.msk [vmem:[%s1866_s13 + $0x20] sm:$0xff] %vm1999_vm0, %v774_v25  ;;  %vm2012_vm9 = vmmov %vm1999_vm0 }
 0x288   : > { %vm2013_vm10 = vmmov %vm1999_vm0 }
 0x289   : > { %v830_v31 = vmul.f32 %v814_v22, %v814_v22  ;;  %vm2014_vm11 = vmmov %vm1999_vm0 }
 0x28b   : > { %v849_v36 = vsel %vm2000_vm12, %v830_v31, 0.0  ;;  %vm2015_vm12 = vmmov %vm1999_vm0 }
 0x28c   : > { %v850_v28 = vadd.f32 %v849_v36, %v848_v30 }
 0x28e   : > { %v777_v19 = vpop.f32.mrf.mxu1 }
 0x28f   : > { %v815_v7 = vsub.f32 %v777_v19, %v1501_v15  ;;  %886 = vst.msk [vmem:[%s1866_s13 + $0x28] sm:$0xff] %vm2001_vm13, %v777_v19  ;;  %vm2016_vm13 = vmmov %vm1999_vm0 }
 0x291   : > { %v831_v29 = vmul.f32 %v815_v7, %v815_v7 }
 0x293   : > { %v851_v35 = vsel %vm2002_vm14, %v831_v29, 0.0  ;;  %vm2017_vm14 = vmmov %vm1999_vm0 }
 0x294   : > { %v852_v18 = vadd.f32 %v851_v35, %v850_v28 }
 0x296   : > { %v780_v34 = vpop.f32.mrf.mxu1 }
 0x297   : > { %887 = vst.msk [vmem:[%s1866_s13 + $0x30] sm:$0xff] %vm2003_vm15, %v780_v34  ;;  %v816_v47 = vsub.f32 %v780_v34, %v1492_v14  ;;  %vm2018_vm15 = vmmov %vm1999_vm0 }
 0x299   : > { %v832_v17 = vmul.f32 %v816_v47, %v816_v47 }
 0x29b   : > { %v853_v48 = vsel %vm2010_vm7, %v832_v17, 0.0 }
 0x29c   : > { %v854_v32 = vadd.f32 %v853_v48, %v852_v18 }
 0x29e   : > { %v783_v39 = vpop.f32.mrf.mxu1 }
 0x29f   : > { %888 = vst.msk [vmem:[%s1866_s13 + $0x38] sm:$0xff] %vm2004_vm1, %v783_v39  ;;  %v817_v13 = vsub.f32 %v783_v39, %v1477_v11  ;;  %vm2019_vm1 = vmmov %vm1999_vm0 }
 0x2a1   : > { %v833_v21 = vmul.f32 %v817_v13, %v817_v13 }
 0x2a3   : > { %v855_v42 = vsel %vm2012_vm9, %v833_v21, 0.0 }
 0x2a4   : > { %v856_v50 = vadd.f32 %v855_v42, %v854_v32 }
 0x2a6   : > { %v786_v41 = vpop.f32.mrf.mxu1 }
 0x2a7   : > { %889 = vst.msk [vmem:[%s1866_s13 + $0x40] sm:$0xff] %vm2005_vm2, %v786_v41  ;;  %v818_v20 = vsub.f32 %v786_v41, %v1465_v9  ;;  %vm2020_vm2 = vmmov %vm1999_vm0 }
 0x2a9   : > { %v834_v33 = vmul.f32 %v818_v20, %v818_v20 }
 0x2ab   : > { %v857_v9 = vsel %vm2013_vm10, %v834_v33, 0.0 }
 0x2ac   : > { %v858_v59 = vadd.f32 %v857_v9, %v856_v50 }
 0x2ae   : > { %v789_v43 = vpop.f32.mrf.mxu1 }
 0x2af   : > { %890 = vst.msk [vmem:[%s1866_s13 + $0x48] sm:$0xff] %vm2006_vm3, %v789_v43  ;;  %v819_v24 = vsub.f32 %v789_v43, %v1456_v8  ;;  %vm2021_vm3 = vmmov %vm1999_vm0 }
 0x2b1   : > { %v835_v14 = vmul.f32 %v819_v24, %v819_v24 }
 0x2b3   : > { %v859_v58 = vsel %vm2014_vm11, %v835_v14, 0.0 }
 0x2b4   : > { %v860_v62 = vadd.f32 %v859_v58, %v858_v59 }
 0x2b6   : > { %v792_v15 = vpop.f32.mrf.mxu1 }
 0x2b7   : > { %891 = vst.msk [vmem:[%s1866_s13 + $0x50] sm:$0xff] %vm2007_vm4, %v792_v15  ;;  %v820_v40 = vsub.f32 %v792_v15, %v1444_v5  ;;  %vm879_vm4 = vcmask 253952  }
 0x2b9   : > { %v836_v38 = vmul.f32 %v820_v40, %v820_v40 }
 0x2bb   : > { %v861_v61 = vsel %vm1999_vm0, %v836_v38, 0.0 }
 0x2bc   : > { %v862_v63 = vadd.f32 %v861_v61, %v860_v62 }
 0x2be   : > { %v795_v45 = vpop.f32.mrf.mxu1 }
 0x2bf   : > { %892 = vst.msk [vmem:[%s1866_s13 + $0x58] sm:$0xff] %vm2008_vm5, %v795_v45  ;;  %v821_v11 = vsub.f32 %v795_v45, %v1435_v4 }
 0x2c1   : > { %v837_v51 = vmul.f32 %v821_v11, %v821_v11 }
 0x2c6   : > { %v798_v46 = vpop.f32.mrf.mxu1 }
 0x2c7   : > { %893 = vst.msk [vmem:[%s1866_s13 + $0x60] sm:$0xff] %vm2009_vm6, %v798_v46  ;;  %v822_v8 = vsub.f32 %v798_v46, %v1426_v3  ;;  %v863_v3 = vsel %vm2016_vm13, %v837_v51, 0.0 }
 0x2c9   : > { %v838_v53 = vmul.f32 %v822_v8, %v822_v8 }
 0x2cb   : > { %v865_v60 = vsel %vm2017_vm14, %v838_v53, 0.0 }
 0x2d4   : > { %v801_v26 = vpop.f32.mrf.mxu3 }
 0x2d5   : > { %894 = vst.msk [vmem:[%s1866_s13 + $0x68] sm:$0xff] %vm2011_vm8, %v801_v26  ;;  %v823_v5 = vsub.f32 %v801_v26, %v1417_v2  ;;  %v864_v2 = vadd.f32 %v863_v3, %v862_v63 }
 0x2d7   : > { %v839_v54 = vmul.f32 %v823_v5, %v823_v5  ;;  %v866_v10 = vadd.f32 %v865_v60, %v864_v2 }
 0x2d9   : > { %v867_v6 = vsel %vm2018_vm15, %v839_v54, 0.0 }
 0x2da   : > { %v868_v16 = vadd.f32 %v867_v6, %v866_v10 }
 0x2dc   : > { %v804_v44 = vpop.f32.mrf.mxu3 }
 0x2dd   : > { %v824_v4 = vsub.f32 %v804_v44, %v1408_v1  ;;  %895 = vst.msk [vmem:[%s1866_s13 + $0x70] sm:$0xff] %vm2015_vm12, %v804_v44  ;;  %v1215_v1 = vld [vmem:[%s1401_s9 + $0x78] sm:$0xff]  ;;  %s234_s9 = scalar_lea.vmem [#allocation4], %s1838_s8 }
 0x2de   : > { %s934_s15 = sshll.u32 %s234_s9, 4  ;;  %s935_s15 = int_to_ptr.vmem [resolvable:$true] %s934_s15 }
 0x2df   : > { %v840_v0 = vmul.f32 %v824_v4, %v824_v4 }
 0x2e1   : > { %v869_v23 = vsel %vm2019_vm1, %v840_v0, 0.0 }
 0x2e2   : > { %v870_v49 = vadd.f32 %v869_v23, %v868_v16 }
 0x2e4   : > { %v807_v27 = vpop.f32.mrf.mxu3 }
 0x2e5   : > { %v825_v12 = vsub.f32 %v807_v27, %v1215_v1  ;;  %896 = vst.msk [vmem:[%s1866_s13 + $0x78] sm:$0xff] %vm2020_vm2, %v807_v27  ;;  %s907_s13 = scalar_lea.sflag [#allocation5], %s1838_s8 }
 0x2e7   : > { %v841_v37 = vmul.f32 %v825_v12, %v825_v12 }
 0x2e9   : > { %v871_v52 = vsel %vm2021_vm3, %v841_v37, 0.0 }
 0x2ea   : > { %v872_v55 = vadd.f32 %v871_v52, %v870_v49 }
 0x2ec   : > { %v873_v56 = vrot.slane %v872_v55, 4 }
 0x2ee   : > { %v874_v57 = vadd.f32 %v873_v56, %v872_v55 }
 0x2f0   : > { %v875_v30 = vrot.slane %v874_v57, 2 }
 0x2f2   : > { %v876_v25 = vadd.f32 %v875_v30, %v874_v57 }
 0x2f4   : > { %v877_v22 = vrot.slane %v876_v25, 1 }
 0x2f6   : > { %v878_v31 = vadd.f32 %v877_v22, %v876_v25 }
 0x2f8   : > { %880 = vst.msk [vmem:[%s234_s9] sm:$0x1] %vm879_vm4, %v878_v31 }
 0x2f9   : > { %1271 = shalt.err (!%p1268_p12)
}
 0x2fa   : > { %1167 = dma.vmem_to_hbm [thread:$0]  (%p1382_p5), %s935_s15, 16, %s937_s16, %s907_s13  }
 0x2fb PF: > { %p1177_p13 = scmp.ge.s32.totalorder %s1310_s21, 2  ;;  %s956_s8 = sand.u32 1, %s1298_s18  }
 0x2fc   : > { %s957_s12 = scalar_lea.sflag [#allocation3], %s956_s8 }
 0x2fd   : > { %p1171_p0 = pnand %p1177_p13, %p1386_p6 }
 0x2ff   : > { %p1172_p1 = pneg %p1171_p0 }
 0x301   : > { %1289 = dma.done.wait (%p1172_p1), %s957_s12, 16  }
 0x302   : > { %1291 = vsyncadd (%p1172_p1), %s957_s12, 4294967280  ;;  %s966_s30 = scalar_lea.sflag [#allocation5], %s956_s8 }
 0x303   : > { %1293 = dma.done.wait (%p1172_p1), %s966_s30, 16  }
 0x304   : > { %1295 = vsyncadd (%p1172_p1), %s966_s30, 4294967280  ;;  %p19_p5 = scmp.ge.s32.totalorder %s1369_s24, 6   ;;  %s2022_s18 = smov %s1302_s19 }
 0x305   : > { %s2023_s19 = smov %s1306_s20  ;;  %s2024_s20 = smov %s1380_s27 }
 0x306   : > { %s2025_s21 = smov %s1369_s24  ;;  %21 = sbr.rel (!%p19_p5) target bundleno = 5 (0x5), region = 96 }
 0x30b   :  { %971 = vsyncpa [#allocation3], 1 }
 0x30c   :  { %973 = vsyncpa [#allocation3 + $0x1], 1 }
 0x30d   :  { %974 = vsyncpa [#allocation5], 1 }
 0x30e   :  { %976 = vsyncpa [#allocation5 + $0x1], 1 }

</bundles_post_ra>
